<compile_context>
chip_gen: v5e
topology: v5e:2x2
jax: 0.10.0
libtpu: 0.0.40
codegen_flags: <defaults>
</compile_context>

<pallas_src>
import functools

import numpy as np
import jax
import jax.numpy as jnp
from jax.experimental import pallas as pl
from jax.experimental.pallas import tpu as pltpu

EPS = 1e-5


# ----------------------------------------------------------------------------
# Parameter packing layout (shared by the host packer and the kernels)
# ----------------------------------------------------------------------------
def _layouts(channels, input_channel, num_arb):
    c4 = channels // 4
    # conv weight matrices (stored transposed [Cin, Cout]), network order.
    # conv2 is stored FOLDED: the duplicated k=4 neighbor slots are summed into
    # the matching k=8 slots at pack time, so Cin = 8*c4 = 2*channels.
    w_shapes = [(input_channel, c4), (2 * channels, channels)]
    for _ in range(num_arb):
        w_shapes += [(channels, 2), (channels, channels),
                     (channels, 2), (channels, channels)]
    w_shapes.append((channels, 1))
    w_offs, row = [], 0
    for (r, _c) in w_shapes:
        w_offs.append(row)
        row += ((r + 15) // 16) * 16          # 16-sublane aligned (bf16 tile)
    w_rows = row

    # bias / gamma / beta vectors, one row each, network order (+ center row)
    v_lens = [c4, c4, c4, channels]
    for _ in range(num_arb):
        v_lens += [2, channels, channels, channels,
                   2, channels, channels, channels]
    v_lens += [1, 4]                           # output bias, keypoint center
    v_rows = ((len(v_lens) + 7) // 8) * 8
    return w_shapes, w_offs, w_rows, v_lens, v_rows


def pack_params(params, image_size, channels=32, input_channel=6, num_arb=2):
    """Pack the flat parameter list into (wpack[bf16], vpack[f32])."""
    assert channels == 32, "GroupNorm(32, C) path assumes C == 32 (group size 1)"
    c4 = channels // 4
    w_shapes, w_offs, w_rows, v_lens, v_rows = _layouts(
        channels, input_channel, num_arb)
    cols = channels
    wpack = np.zeros((w_rows, cols), np.float32)
    vpack = np.zeros((v_rows, cols), np.float32)
    wi = vi = 0
    for p in params:
        p = np.asarray(p, np.float32)
        if p.ndim == 2:                        # conv weight (already transposed)
            if wi == 1:
                # conv2: fold the duplicated k=4 neighbor slots into the weight
                # (grouped slab becomes [BN, 8*c4] instead of [BN, 12*c4]).
                assert p.shape == (12 * c4, channels), p.shape
                folded = p[4 * c4:].copy()     # k=8 copy, neighbors 0..7
                folded[:4 * c4] += p[:4 * c4]  # + k=4 copy, neighbors 0..3
                p = folded
            r, c = w_shapes[wi]
            assert p.shape == (r, c), (p.shape, (r, c))
            wpack[w_offs[wi]:w_offs[wi] + r, :c] = p
            wi += 1
        else:                                  # bias / gamma / beta vector
            c = v_lens[vi]
            assert p.shape == (c,), (p.shape, c)
            vpack[vi, :c] = p
            vi += 1
    assert wi == len(w_shapes) and vi == len(v_lens) - 1
    width, height = float(image_size[0]), float(image_size[1])
    vpack[vi, :4] = np.array([width / 2, height / 2, width / 2, height / 2],
                             np.float32)
    return jnp.asarray(wpack, jnp.bfloat16), jnp.asarray(vpack, jnp.float32)


# ----------------------------------------------------------------------------
# Kernel A: front end (gridless — BatchNorm couples the batches)
# ----------------------------------------------------------------------------
def _front_kernel(channels, input_channel, num_arb, B, N,
                  xs_ref, wp_ref, vp_ref, o_ref):
    c4 = channels // 4
    BN = B * N
    w_shapes, w_offs, _, v_lens, _ = _layouts(channels, input_channel, num_arb)

    # normalize_keypoints: (xs - center) / 1050  (1050 is literal in the ref)
    center = vp_ref[len(v_lens) - 1:len(v_lens), 0:4]              # [1, 4]
    xs_n = (xs_ref[...] - center) * jnp.float32(1.0 / 1050.0)
    data6 = jnp.concatenate([xs_n[:, 0:2] - xs_n[:, 2:4], xs_n], axis=-1)

    # conv1 (1x1) == one MXU dot on the flat [BN, 6] slab (bf16 in, f32 acc)
    w1 = wp_ref[w_offs[0]:w_offs[0] + w_shapes[0][0], 0:c4]        # [6, c4]
    b1 = vp_ref[0:1, 0:c4]
    x = jnp.dot(data6.astype(jnp.bfloat16), w1,
                preferred_element_type=jnp.float32) + b1           # [BN, c4]

    # InstanceNorm2d: per-(batch, channel) over N, biased variance.
    # [B, N, C] reshape + axis-1 reductions — no O((BN)^2) segment matrices.
    x3 = x.reshape(B, N, c4)
    m = jnp.mean(x3, axis=1, keepdims=True)
    xc = x3 - m
    v = jnp.mean(xc * xc, axis=1, keepdims=True)
    x = (xc * jax.lax.rsqrt(v + EPS)).reshape(BN, c4)

    # BatchNorm2d with batch (training-mode) statistics over all B*N rows.
    bn_g = vp_ref[1:2, 0:c4]
    bn_b = vp_ref[2:3, 0:c4]
    mu = jnp.mean(x, axis=0, keepdims=True)
    xc = x - mu
    var = jnp.mean(xc * xc, axis=0, keepdims=True)
    x = bn_g * (xc * jax.lax.rsqrt(var + EPS)) + bn_b
    o_ref[...] = jnp.maximum(x, 0.0).astype(jnp.bfloat16)


# ----------------------------------------------------------------------------
# Kernel B: conv2 + ARB stack + output, one grid step per batch
# ----------------------------------------------------------------------------
def _body_kernel(channels, input_channel, num_arb, N,
                 g_ref, wp_ref, vp_ref, o_ref):
    w_shapes, w_offs, _, v_lens, _ = _layouts(channels, input_channel, num_arb)

    w_it = iter(range(1, len(w_shapes)))        # conv2 .. output conv
    v_it = iter(range(3, len(v_lens) - 1))      # conv2 bias .. output bias

    def W():                                    # next packed weight [Cin, Cout]
        i = next(w_it)
        r, c = w_shapes[i]
        return wp_ref[w_offs[i]:w_offs[i] + r, 0:c]

    def V():                                    # next packed vector as [1, len]
        i = next(v_it)
        return vp_ref[i:i + 1, 0:v_lens[i]]

    def dot(x, w):                              # bf16 operands, f32 accumulate
        return jnp.dot(x.astype(jnp.bfloat16), w,
                       preferred_element_type=jnp.float32)

    def acn(x, w, b):
        # Attentive Context Normalization on this batch's [N, C] block.
        att = dot(x, w) + b                                        # [N, 2]
        a_l = 0.5 * (jnp.tanh(0.5 * att[:, 0:1]) + 1.0)            # sigmoid, 1 EUP op
        g = att[:, 1:2]
        # Per-batch softmax over N: its denominator cancels exactly in the
        # subsequent a / sum(a), so only the max-shifted numerator is needed.
        a_un = a_l * jnp.exp(g - jnp.max(g, axis=0, keepdims=True))
        denom = jnp.sum(a_un, axis=0, keepdims=True)               # [1, 1]
        inv = 1.0 / denom                                          # exact (parity)
        mean = jnp.sum(x * a_un, axis=0, keepdims=True) * inv      # [1, C]
        out = x - mean
        var = jnp.sum(a_un * out * out, axis=0, keepdims=True) * inv
        return out * jax.lax.rsqrt(var + EPS)

    def group_norm(x, gamma, beta):
        # GroupNorm(32, 32): group size 1 -> per-channel over N (this batch).
        m = jnp.mean(x, axis=0, keepdims=True)
        xc = x - m
        v = jnp.mean(xc * xc, axis=0, keepdims=True)
        return gamma * (xc * jax.lax.rsqrt(v + EPS)) + beta

    # conv2 on the de-duplicated grouped slab (k=4 slots folded into the weight)
    x = dot(g_ref[...], W()) + V()                                 # [N, C]

    for _ in range(num_arb):
        w_a1 = W(); b_a1 = V(); gn1_g = V(); gn1_b = V()
        w_cA = W(); b_cA = V()
        w_a2 = W(); b_a2 = V(); gn2_g = V(); gn2_b = V()
        w_cB = W(); b_cB = V()

        y = acn(x, w_a1, b_a1)
        y = group_norm(y, gn1_g, gn1_b)
        y = jnp.maximum(y, 0.0)
        y = dot(y, w_cA) + b_cA
        y = acn(y, w_a2, b_a2)
        y = group_norm(y, gn2_g, gn2_b)
        y = jnp.maximum(y, 0.0)
        y = dot(y, w_cB) + b_cB
        x = x + y                                                  # residual

    # output conv -> [N, 1] logits (1-lane store; negligible at this size)
    o_ref[...] = dot(x, W()) + V()


# ----------------------------------------------------------------------------
# Wrapper
# ----------------------------------------------------------------------------
def lmc_forward(xs, wpack, vpack, *, channels, input_channel, num_arb):
    """xs: [B, N, 4] raw keypoint correspondences; returns logits [B, N]."""
    B, N, _ = xs.shape
    c4 = channels // 4
    BN = B * N

    # k-NN indices: pairwise squared distances over V + top_k (not argsort).
    # TODO(synk): sort/top-k has no clean Pallas TPU equivalent -> XLA glue.
    v = xs[:, :, :2] - xs[:, :, 2:4]
    d = jnp.sum((v[:, :, None, :] - v[:, None, :, :]) ** 2, axis=-1)  # [B,N,N]
    _, nn_idx = jax.lax.top_k(-d, 8)                                  # 8 nearest
    nn_flat = (nn_idx.astype(jnp.int32)
               + (jnp.arange(B, dtype=jnp.int32) * N)[:, None, None]
               ).reshape(BN, 8)

    xs_flat = xs.reshape(BN, 4).astype(jnp.float32)

    # ---- kernel A: front end ------------------------------------------------
    front = functools.partial(_front_kernel, channels, input_channel, num_arb,
                              B, N)
    x1 = pl.pallas_call(
        front,
        out_shape=jax.ShapeDtypeStruct((BN, c4), jnp.bfloat16),
        in_specs=[pl.BlockSpec(memory_space=pltpu.MemorySpace.VMEM)] * 3,
        out_specs=pl.BlockSpec(memory_space=pltpu.MemorySpace.VMEM),
        compiler_params=pltpu.CompilerParams(vmem_limit_bytes=32 * 1024 * 1024),
    )(xs_flat, wpack, vpack)

    # ---- neighbor gather in XLA (linear in N; no BN^2 one-hots in VMEM) ------
    grouped = x1[nn_flat].reshape(BN, 8 * c4)              # [BN, 64] bf16

    # ---- kernel B: conv2 + ARBs + output, gridded per batch ------------------
    body = functools.partial(_body_kernel, channels, input_channel, num_arb, N)
    flops = 2 * BN * (8 * c4 * channels
                      + num_arb * (2 * channels * channels + 4 * channels)
                      + channels)
    cost = pl.CostEstimate(
        flops=int(flops),
        transcendentals=int(4 * num_arb * BN),
        bytes_accessed=int(grouped.size * 2 + wpack.size * 2
                           + vpack.size * 4 + BN * 4))
    out = pl.pallas_call(
        body,
        out_shape=jax.ShapeDtypeStruct((BN, 1), jnp.float32),
        grid=(B,),
        in_specs=[pl.BlockSpec((N, 8 * c4), lambda b: (b, 0)),
                  pl.BlockSpec(wpack.shape, lambda b: (0, 0)),
                  pl.BlockSpec(vpack.shape, lambda b: (0, 0))],
        out_specs=pl.BlockSpec((N, 1), lambda b: (b, 0)),
        compiler_params=pltpu.CompilerParams(
            dimension_semantics=("parallel",),          # megacore on v7x
            vmem_limit_bytes=32 * 1024 * 1024),
        cost_estimate=cost,
    )(grouped, wpack, vpack)
    return out.reshape(B, N)


# ----------------------------------------------------------------------------
# Deterministic parameter initialization (shapes from LMC_network.__init__)
# ----------------------------------------------------------------------------
def init_params(key, channels=32, input_channel=6, num_arb=2):
    c4 = channels // 4

    def conv(k, cin, cout):
        k1, k2 = jax.random.split(k)
        bound = 1.0 / np.sqrt(cin)
        w = jax.random.uniform(k1, (cout, cin), jnp.float32, -bound, bound)
        b = jax.random.uniform(k2, (cout,), jnp.float32, -bound, bound)
        return w.T, b                       # weight stored transposed [cin, cout]

    keys = iter(jax.random.split(key, 64))
    params = []
    wt, b = conv(next(keys), input_channel, c4); params += [wt, b]      # conv1
    params += [jnp.ones((c4,), jnp.float32),
               jnp.zeros((c4,), jnp.float32)]                            # bn1
    wt, b = conv(next(keys), 3 * channels, channels); params += [wt, b]  # conv2
    for _ in range(num_arb):                                             # ARBs
        wt, b = conv(next(keys), channels, 2); params += [wt, b]         # ACN 1
        params += [jnp.ones((channels,), jnp.float32),
                   jnp.zeros((channels,), jnp.float32)]                  # GN 1
        wt, b = conv(next(keys), channels, channels); params += [wt, b]  # conv A
        wt, b = conv(next(keys), channels, 2); params += [wt, b]         # ACN 2
        params += [jnp.ones((channels,), jnp.float32),
                   jnp.zeros((channels,), jnp.float32)]                  # GN 2
        wt, b = conv(next(keys), channels, channels); params += [wt, b]  # conv B
    wt, b = conv(next(keys), channels, 1); params += [wt, b]             # output
    return params


if __name__ == "__main__":
    # config: net_channels=32, net_depth=1, iter_num=0, use_ratio=0,
    # use_mutual=0 (side_channel=0), image_zise=(640, 480)
    # -> depth_each_stage=1 -> MLP has 2 ARB blocks.
    B, N, channels, input_channel = 2, 16, 32, 6
    num_arb = 2
    image_size = (640, 480)   # (width, height) as consumed by normalize_keypoints

    key = jax.random.PRNGKey(0)
    k_xs, k_params = jax.random.split(key)
    xs = jax.random.uniform(k_xs, (B, N, 4), jnp.float32) * jnp.array(
        [640.0, 480.0, 640.0, 480.0], jnp.float32)

    params = init_params(k_params, channels=channels,
                         input_channel=input_channel, num_arb=num_arb)
    wpack, vpack = pack_params(params, image_size, channels=channels,
                               input_channel=input_channel, num_arb=num_arb)

    fwd = jax.jit(functools.partial(lmc_forward, channels=channels,
                                    input_channel=input_channel,
                                    num_arb=num_arb))
    logits = fwd(xs, wpack, vpack)
    jax.block_until_ready(logits)
    assert logits.shape == (B, N), logits.shape
    assert bool(jnp.all(jnp.isfinite(logits)))
    print("KERNEL_OK")
</pallas_src>

<mosaic_0001>
module attributes {stable_mosaic.version = 11 : i64} {
  func.func @_front_kernel(%arg0: memref<32x4xf32, #tpu.memory_space<vmem>>, %arg1: memref<368x32xbf16, #tpu.memory_space<vmem>>, %arg2: memref<24x32xf32, #tpu.memory_space<vmem>>, %arg3: memref<32x8xbf16, #tpu.memory_space<vmem>>) attributes {dimension_semantics = [], scalar_prefetch = 0 : i64, scratch_operands = 0 : i64, tpu.core_type = #tpu.core_type<tc>} {
    %c21 = arith.constant 21 : index
    %c0 = arith.constant 0 : index
    %0 = vector.load %arg2[%c21, %c0] : memref<24x32xf32, #tpu.memory_space<vmem>>, vector<1x4xf32>
    %c0_0 = arith.constant 0 : index
    %c0_1 = arith.constant 0 : index
    %1 = vector.load %arg0[%c0_0, %c0_1] : memref<32x4xf32, #tpu.memory_space<vmem>>, vector<32x4xf32>
    %2 = vector.broadcast %0 : vector<1x4xf32> to vector<32x4xf32>
    %3 = arith.subf %1, %2 : vector<32x4xf32>
    %cst = arith.constant 9.52380942E-4 : f32
    %4 = vector.broadcast %cst : f32 to vector<32x4xf32>
    %5 = arith.mulf %3, %4 : vector<32x4xf32>
    %6 = vector.extract_strided_slice %5 {offsets = [0, 0], sizes = [32, 2], strides = [1, 1]} : vector<32x4xf32> to vector<32x2xf32>
    %7 = vector.extract_strided_slice %5 {offsets = [0, 2], sizes = [32, 2], strides = [1, 1]} : vector<32x4xf32> to vector<32x2xf32>
    %8 = arith.subf %6, %7 : vector<32x2xf32>
    %9 = tpu.concatenate %8, %5 in 1 : vector<32x2xf32>, vector<32x4xf32> -> vector<32x6xf32>
    %c0_2 = arith.constant 0 : index
    %c0_3 = arith.constant 0 : index
    %10 = vector.load %arg1[%c0_2, %c0_3] : memref<368x32xbf16, #tpu.memory_space<vmem>>, vector<6x8xbf16>
    %c0_4 = arith.constant 0 : index
    %c0_5 = arith.constant 0 : index
    %11 = vector.load %arg2[%c0_4, %c0_5] : memref<24x32xf32, #tpu.memory_space<vmem>>, vector<1x8xf32>
    %12 = arith.truncf %9 : vector<32x6xf32> to vector<32x6xbf16>
    %cst_6 = arith.constant dense<0.000000e+00> : vector<32x8xf32>
    %13 = tpu.matmul %12, %10, %cst_6 {dimension_numbers = #tpu.dot_dimension_numbers<[1], [0], [0], [1], [0, 0, 1, 1], [], []>} : vector<32x6xbf16>, vector<6x8xbf16>, vector<32x8xf32> -> vector<32x8xf32>
    %14 = vector.broadcast %11 : vector<1x8xf32> to vector<32x8xf32>
    %15 = arith.addf %13, %14 : vector<32x8xf32>
    %16 = vector.shape_cast %15 : vector<32x8xf32> to vector<2x16x8xf32>
    %cst_7 = arith.constant dense<0.000000e+00> : vector<2x8xf32>
    %17 = vector.multi_reduction <add>, %16, %cst_7 [1] : vector<2x16x8xf32> to vector<2x8xf32>
    %18 = vector.shape_cast %17 : vector<2x8xf32> to vector<2x1x8xf32>
    %cst_8 = arith.constant 1.600000e+01 : f32
    %19 = vector.broadcast %cst_8 : f32 to vector<2x1x8xf32>
    %20 = arith.divf %18, %19 : vector<2x1x8xf32>
    %21 = vector.broadcast %20 : vector<2x1x8xf32> to vector<2x16x8xf32>
    %22 = arith.subf %16, %21 : vector<2x16x8xf32>
    %23 = arith.mulf %22, %22 : vector<2x16x8xf32>
    %cst_9 = arith.constant dense<0.000000e+00> : vector<2x8xf32>
    %24 = vector.multi_reduction <add>, %23, %cst_9 [1] : vector<2x16x8xf32> to vector<2x8xf32>
    %25 = vector.shape_cast %24 : vector<2x8xf32> to vector<2x1x8xf32>
    %cst_10 = arith.constant 1.600000e+01 : f32
    %26 = vector.broadcast %cst_10 : f32 to vector<2x1x8xf32>
    %27 = arith.divf %25, %26 : vector<2x1x8xf32>
    %cst_11 = arith.constant 9.99999974E-6 : f32
    %28 = vector.broadcast %cst_11 : f32 to vector<2x1x8xf32>
    %29 = arith.addf %27, %28 : vector<2x1x8xf32>
    %30 = math.rsqrt %29 : vector<2x1x8xf32>
    %31 = vector.broadcast %30 : vector<2x1x8xf32> to vector<2x16x8xf32>
    %32 = arith.mulf %22, %31 : vector<2x16x8xf32>
    %33 = vector.shape_cast %32 : vector<2x16x8xf32> to vector<32x8xf32>
    %c1 = arith.constant 1 : index
    %c0_12 = arith.constant 0 : index
    %34 = vector.load %arg2[%c1, %c0_12] : memref<24x32xf32, #tpu.memory_space<vmem>>, vector<1x8xf32>
    %c2 = arith.constant 2 : index
    %c0_13 = arith.constant 0 : index
    %35 = vector.load %arg2[%c2, %c0_13] : memref<24x32xf32, #tpu.memory_space<vmem>>, vector<1x8xf32>
    %cst_14 = arith.constant dense<0.000000e+00> : vector<8xf32>
    %36 = vector.multi_reduction <add>, %33, %cst_14 [0] : vector<32x8xf32> to vector<8xf32>
    %37 = vector.shape_cast %36 : vector<8xf32> to vector<1x8xf32>
    %cst_15 = arith.constant 3.200000e+01 : f32
    %38 = vector.broadcast %cst_15 : f32 to vector<1x8xf32>
    %39 = arith.divf %37, %38 : vector<1x8xf32>
    %40 = vector.broadcast %39 : vector<1x8xf32> to vector<32x8xf32>
    %41 = arith.subf %33, %40 : vector<32x8xf32>
    %42 = arith.mulf %41, %41 : vector<32x8xf32>
    %cst_16 = arith.constant dense<0.000000e+00> : vector<8xf32>
    %43 = vector.multi_reduction <add>, %42, %cst_16 [0] : vector<32x8xf32> to vector<8xf32>
    %44 = vector.shape_cast %43 : vector<8xf32> to vector<1x8xf32>
    %cst_17 = arith.constant 3.200000e+01 : f32
    %45 = vector.broadcast %cst_17 : f32 to vector<1x8xf32>
    %46 = arith.divf %44, %45 : vector<1x8xf32>
    %cst_18 = arith.constant 9.99999974E-6 : f32
    %47 = vector.broadcast %cst_18 : f32 to vector<1x8xf32>
    %48 = arith.addf %46, %47 : vector<1x8xf32>
    %49 = math.rsqrt %48 : vector<1x8xf32>
    %50 = vector.broadcast %49 : vector<1x8xf32> to vector<32x8xf32>
    %51 = arith.mulf %41, %50 : vector<32x8xf32>
    %52 = vector.broadcast %34 : vector<1x8xf32> to vector<32x8xf32>
    %53 = arith.mulf %52, %51 : vector<32x8xf32>
    %54 = vector.broadcast %35 : vector<1x8xf32> to vector<32x8xf32>
    %55 = arith.addf %53, %54 : vector<32x8xf32>
    %cst_19 = arith.constant 0.000000e+00 : f32
    %56 = vector.broadcast %cst_19 : f32 to vector<32x8xf32>
    %57 = arith.maximumf %55, %56 : vector<32x8xf32>
    %58 = arith.truncf %57 : vector<32x8xf32> to vector<32x8xbf16>
    %c0_20 = arith.constant 0 : index
    %c0_21 = arith.constant 0 : index
    %59 = vector.load %arg3[%c0_20, %c0_21] : memref<32x8xbf16, #tpu.memory_space<vmem>>, vector<32x8xbf16>
    tpu.vector_store %arg3[%c0_20, %c0_21], %58 {strides = array<i32>} : memref<32x8xbf16, #tpu.memory_space<vmem>>, vector<32x8xbf16>,
    return
  }
}

module attributes {stable_mosaic.version = 11 : i64} {
  func.func @_body_kernel(%arg0: i32, %arg1: memref<16x64xbf16, #tpu.memory_space<vmem>>, %arg2: memref<368x32xbf16, #tpu.memory_space<vmem>>, %arg3: memref<24x32xf32, #tpu.memory_space<vmem>>, %arg4: memref<16x1xf32, #tpu.memory_space<vmem>>) attributes {dimension_semantics = [#tpu.dimension_semantics<parallel>], iteration_bounds = array<i64: 2>, scalar_prefetch = 0 : i64, scratch_operands = 0 : i64, tpu.core_type = #tpu.core_type<tc>, window_params = [{transform_indices = @transform_0, window_bounds = array<i64: 16, 64>}, {pipeline_mode = #tpu.pipeline_mode<synchronous>, transform_indices = @transform_1, window_bounds = array<i64: 368, 32>}, {pipeline_mode = #tpu.pipeline_mode<synchronous>, transform_indices = @transform_2, window_bounds = array<i64: 24, 32>}, {transform_indices = @transform_3, window_bounds = array<i64: 16, 1>}]} {
    %c0 = arith.constant 0 : index
    %c0_0 = arith.constant 0 : index
    %0 = vector.load %arg1[%c0, %c0_0] : memref<16x64xbf16, #tpu.memory_space<vmem>>, vector<16x64xbf16>
    %c16 = arith.constant 16 : index
    %c0_1 = arith.constant 0 : index
    %1 = vector.load %arg2[%c16, %c0_1] : memref<368x32xbf16, #tpu.memory_space<vmem>>, vector<64x32xbf16>
    %cst = arith.constant dense<0.000000e+00> : vector<16x32xf32>
    %2 = tpu.matmul %0, %1, %cst {dimension_numbers = #tpu.dot_dimension_numbers<[1], [0], [0], [1], [0, 0, 1, 1], [], []>} : vector<16x64xbf16>, vector<64x32xbf16>, vector<16x32xf32> -> vector<16x32xf32>
    %c3 = arith.constant 3 : index
    %c0_2 = arith.constant 0 : index
    %3 = vector.load %arg3[%c3, %c0_2] : memref<24x32xf32, #tpu.memory_space<vmem>>, vector<1x32xf32>
    %4 = vector.broadcast %3 : vector<1x32xf32> to vector<16x32xf32>
    %5 = arith.addf %2, %4 : vector<16x32xf32>
    %c80 = arith.constant 80 : index
    %c0_3 = arith.constant 0 : index
    %6 = vector.load %arg2[%c80, %c0_3] : memref<368x32xbf16, #tpu.memory_space<vmem>>, vector<32x2xbf16>
    %c4 = arith.constant 4 : index
    %c0_4 = arith.constant 0 : index
    %7 = vector.load %arg3[%c4, %c0_4] : memref<24x32xf32, #tpu.memory_space<vmem>>, vector<1x2xf32>
    %c5 = arith.constant 5 : index
    %c0_5 = arith.constant 0 : index
    %8 = vector.load %arg3[%c5, %c0_5] : memref<24x32xf32, #tpu.memory_space<vmem>>, vector<1x32xf32>
    %c6 = arith.constant 6 : index
    %c0_6 = arith.constant 0 : index
    %9 = vector.load %arg3[%c6, %c0_6] : memref<24x32xf32, #tpu.memory_space<vmem>>, vector<1x32xf32>
    %c112 = arith.constant 112 : index
    %c0_7 = arith.constant 0 : index
    %10 = vector.load %arg2[%c112, %c0_7] : memref<368x32xbf16, #tpu.memory_space<vmem>>, vector<32x32xbf16>
    %c7 = arith.constant 7 : index
    %c0_8 = arith.constant 0 : index
    %11 = vector.load %arg3[%c7, %c0_8] : memref<24x32xf32, #tpu.memory_space<vmem>>, vector<1x32xf32>
    %c144 = arith.constant 144 : index
    %c0_9 = arith.constant 0 : index
    %12 = vector.load %arg2[%c144, %c0_9] : memref<368x32xbf16, #tpu.memory_space<vmem>>, vector<32x2xbf16>
    %c8 = arith.constant 8 : index
    %c0_10 = arith.constant 0 : index
    %13 = vector.load %arg3[%c8, %c0_10] : memref<24x32xf32, #tpu.memory_space<vmem>>, vector<1x2xf32>
    %c9 = arith.constant 9 : index
    %c0_11 = arith.constant 0 : index
    %14 = vector.load %arg3[%c9, %c0_11] : memref<24x32xf32, #tpu.memory_space<vmem>>, vector<1x32xf32>
    %c10 = arith.constant 10 : index
    %c0_12 = arith.constant 0 : index
    %15 = vector.load %arg3[%c10, %c0_12] : memref<24x32xf32, #tpu.memory_space<vmem>>, vector<1x32xf32>
    %c176 = arith.constant 176 : index
    %c0_13 = arith.constant 0 : index
    %16 = vector.load %arg2[%c176, %c0_13] : memref<368x32xbf16, #tpu.memory_space<vmem>>, vector<32x32xbf16>
    %c11 = arith.constant 11 : index
    %c0_14 = arith.constant 0 : index
    %17 = vector.load %arg3[%c11, %c0_14] : memref<24x32xf32, #tpu.memory_space<vmem>>, vector<1x32xf32>
    %18 = arith.truncf %5 : vector<16x32xf32> to vector<16x32xbf16>
    %cst_15 = arith.constant dense<0.000000e+00> : vector<16x2xf32>
    %19 = tpu.matmul %18, %6, %cst_15 {dimension_numbers = #tpu.dot_dimension_numbers<[1], [0], [0], [1], [0, 0, 1, 1], [], []>} : vector<16x32xbf16>, vector<32x2xbf16>, vector<16x2xf32> -> vector<16x2xf32>
    %20 = vector.broadcast %7 : vector<1x2xf32> to vector<16x2xf32>
    %21 = arith.addf %19, %20 : vector<16x2xf32>
    %22 = vector.extract_strided_slice %21 {offsets = [0, 0], sizes = [16, 1], strides = [1, 1]} : vector<16x2xf32> to vector<16x1xf32>
    %cst_16 = arith.constant 5.000000e-01 : f32
    %23 = vector.broadcast %cst_16 : f32 to vector<16x1xf32>
    %24 = arith.mulf %23, %22 : vector<16x1xf32>
    %25 = math.tanh %24 : vector<16x1xf32>
    %cst_17 = arith.constant 1.000000e+00 : f32
    %26 = vector.broadcast %cst_17 : f32 to vector<16x1xf32>
    %27 = arith.addf %25, %26 : vector<16x1xf32>
    %cst_18 = arith.constant 5.000000e-01 : f32
    %28 = vector.broadcast %cst_18 : f32 to vector<16x1xf32>
    %29 = arith.mulf %28, %27 : vector<16x1xf32>
    %30 = vector.extract_strided_slice %21 {offsets = [0, 1], sizes = [16, 1], strides = [1, 1]} : vector<16x2xf32> to vector<16x1xf32>
    %cst_19 = arith.constant dense<0xFF800000> : vector<1xf32>
    %31 = vector.multi_reduction <maximumf>, %30, %cst_19 [0] : vector<16x1xf32> to vector<1xf32>
    %32 = vector.shape_cast %31 : vector<1xf32> to vector<1x1xf32>
    %33 = vector.broadcast %32 : vector<1x1xf32> to vector<16x1xf32>
    %34 = arith.subf %30, %33 : vector<16x1xf32>
    %35 = math.exp %34 : vector<16x1xf32>
    %36 = arith.mulf %29, %35 : vector<16x1xf32>
    %cst_20 = arith.constant dense<0.000000e+00> : vector<1xf32>
    %37 = vector.multi_reduction <add>, %36, %cst_20 [0] : vector<16x1xf32> to vector<1xf32>
    %38 = vector.shape_cast %37 : vector<1xf32> to vector<1x1xf32>
    %cst_21 = arith.constant 1.000000e+00 : f32
    %39 = vector.broadcast %cst_21 : f32 to vector<1x1xf32>
    %40 = arith.divf %39, %38 : vector<1x1xf32>
    %41 = vector.broadcast %36 : vector<16x1xf32> to vector<16x32xf32>
    %42 = arith.mulf %5, %41 : vector<16x32xf32>
    %cst_22 = arith.constant dense<0.000000e+00> : vector<32xf32>
    %43 = vector.multi_reduction <add>, %42, %cst_22 [0] : vector<16x32xf32> to vector<32xf32>
    %44 = vector.shape_cast %43 : vector<32xf32> to vector<1x32xf32>
    %45 = vector.broadcast %40 : vector<1x1xf32> to vector<1x32xf32>
    %46 = arith.mulf %44, %45 : vector<1x32xf32>
    %47 = vector.broadcast %46 : vector<1x32xf32> to vector<16x32xf32>
    %48 = arith.subf %5, %47 : vector<16x32xf32>
    %49 = vector.broadcast %36 : vector<16x1xf32> to vector<16x32xf32>
    %50 = arith.mulf %49, %48 : vector<16x32xf32>
    %51 = arith.mulf %50, %48 : vector<16x32xf32>
    %cst_23 = arith.constant dense<0.000000e+00> : vector<32xf32>
    %52 = vector.multi_reduction <add>, %51, %cst_23 [0] : vector<16x32xf32> to vector<32xf32>
    %53 = vector.shape_cast %52 : vector<32xf32> to vector<1x32xf32>
    %54 = vector.broadcast %40 : vector<1x1xf32> to vector<1x32xf32>
    %55 = arith.mulf %53, %54 : vector<1x32xf32>
    %cst_24 = arith.constant 9.99999974E-6 : f32
    %56 = vector.broadcast %cst_24 : f32 to vector<1x32xf32>
    %57 = arith.addf %55, %56 : vector<1x32xf32>
    %58 = math.rsqrt %57 : vector<1x32xf32>
    %59 = vector.broadcast %58 : vector<1x32xf32> to vector<16x32xf32>
    %60 = arith.mulf %48, %59 : vector<16x32xf32>
    %cst_25 = arith.constant dense<0.000000e+00> : vector<32xf32>
    %61 = vector.multi_reduction <add>, %60, %cst_25 [0] : vector<16x32xf32> to vector<32xf32>
    %62 = vector.shape_cast %61 : vector<32xf32> to vector<1x32xf32>
    %cst_26 = arith.constant 1.600000e+01 : f32
    %63 = vector.broadcast %cst_26 : f32 to vector<1x32xf32>
    %64 = arith.divf %62, %63 : vector<1x32xf32>
    %65 = vector.broadcast %64 : vector<1x32xf32> to vector<16x32xf32>
    %66 = arith.subf %60, %65 : vector<16x32xf32>
    %67 = arith.mulf %66, %66 : vector<16x32xf32>
    %cst_27 = arith.constant dense<0.000000e+00> : vector<32xf32>
    %68 = vector.multi_reduction <add>, %67, %cst_27 [0] : vector<16x32xf32> to vector<32xf32>
    %69 = vector.shape_cast %68 : vector<32xf32> to vector<1x32xf32>
    %cst_28 = arith.constant 1.600000e+01 : f32
    %70 = vector.broadcast %cst_28 : f32 to vector<1x32xf32>
    %71 = arith.divf %69, %70 : vector<1x32xf32>
    %cst_29 = arith.constant 9.99999974E-6 : f32
    %72 = vector.broadcast %cst_29 : f32 to vector<1x32xf32>
    %73 = arith.addf %71, %72 : vector<1x32xf32>
    %74 = math.rsqrt %73 : vector<1x32xf32>
    %75 = vector.broadcast %74 : vector<1x32xf32> to vector<16x32xf32>
    %76 = arith.mulf %66, %75 : vector<16x32xf32>
    %77 = vector.broadcast %8 : vector<1x32xf32> to vector<16x32xf32>
    %78 = arith.mulf %77, %76 : vector<16x32xf32>
    %79 = vector.broadcast %9 : vector<1x32xf32> to vector<16x32xf32>
    %80 = arith.addf %78, %79 : vector<16x32xf32>
    %cst_30 = arith.constant 0.000000e+00 : f32
    %81 = vector.broadcast %cst_30 : f32 to vector<16x32xf32>
    %82 = arith.maximumf %80, %81 : vector<16x32xf32>
    %83 = arith.truncf %82 : vector<16x32xf32> to vector<16x32xbf16>
    %cst_31 = arith.constant dense<0.000000e+00> : vector<16x32xf32>
    %84 = tpu.matmul %83, %10, %cst_31 {dimension_numbers = #tpu.dot_dimension_numbers<[1], [0], [0], [1], [0, 0, 1, 1], [], []>} : vector<16x32xbf16>, vector<32x32xbf16>, vector<16x32xf32> -> vector<16x32xf32>
    %85 = vector.broadcast %11 : vector<1x32xf32> to vector<16x32xf32>
    %86 = arith.addf %84, %85 : vector<16x32xf32>
    %87 = arith.truncf %86 : vector<16x32xf32> to vector<16x32xbf16>
    %cst_32 = arith.constant dense<0.000000e+00> : vector<16x2xf32>
    %88 = tpu.matmul %87, %12, %cst_32 {dimension_numbers = #tpu.dot_dimension_numbers<[1], [0], [0], [1], [0, 0, 1, 1], [], []>} : vector<16x32xbf16>, vector<32x2xbf16>, vector<16x2xf32> -> vector<16x2xf32>
    %89 = vector.broadcast %13 : vector<1x2xf32> to vector<16x2xf32>
    %90 = arith.addf %88, %89 : vector<16x2xf32>
    %91 = vector.extract_strided_slice %90 {offsets = [0, 0], sizes = [16, 1], strides = [1, 1]} : vector<16x2xf32> to vector<16x1xf32>
    %cst_33 = arith.constant 5.000000e-01 : f32
    %92 = vector.broadcast %cst_33 : f32 to vector<16x1xf32>
    %93 = arith.mulf %92, %91 : vector<16x1xf32>
    %94 = math.tanh %93 : vector<16x1xf32>
    %cst_34 = arith.constant 1.000000e+00 : f32
    %95 = vector.broadcast %cst_34 : f32 to vector<16x1xf32>
    %96 = arith.addf %94, %95 : vector<16x1xf32>
    %cst_35 = arith.constant 5.000000e-01 : f32
    %97 = vector.broadcast %cst_35 : f32 to vector<16x1xf32>
    %98 = arith.mulf %97, %96 : vector<16x1xf32>
    %99 = vector.extract_strided_slice %90 {offsets = [0, 1], sizes = [16, 1], strides = [1, 1]} : vector<16x2xf32> to vector<16x1xf32>
    %cst_36 = arith.constant dense<0xFF800000> : vector<1xf32>
    %100 = vector.multi_reduction <maximumf>, %99, %cst_36 [0] : vector<16x1xf32> to vector<1xf32>
    %101 = vector.shape_cast %100 : vector<1xf32> to vector<1x1xf32>
    %102 = vector.broadcast %101 : vector<1x1xf32> to vector<16x1xf32>
    %103 = arith.subf %99, %102 : vector<16x1xf32>
    %104 = math.exp %103 : vector<16x1xf32>
    %105 = arith.mulf %98, %104 : vector<16x1xf32>
    %cst_37 = arith.constant dense<0.000000e+00> : vector<1xf32>
    %106 = vector.multi_reduction <add>, %105, %cst_37 [0] : vector<16x1xf32> to vector<1xf32>
    %107 = vector.shape_cast %106 : vector<1xf32> to vector<1x1xf32>
    %cst_38 = arith.constant 1.000000e+00 : f32
    %108 = vector.broadcast %cst_38 : f32 to vector<1x1xf32>
    %109 = arith.divf %108, %107 : vector<1x1xf32>
    %110 = vector.broadcast %105 : vector<16x1xf32> to vector<16x32xf32>
    %111 = arith.mulf %86, %110 : vector<16x32xf32>
    %cst_39 = arith.constant dense<0.000000e+00> : vector<32xf32>
    %112 = vector.multi_reduction <add>, %111, %cst_39 [0] : vector<16x32xf32> to vector<32xf32>
    %113 = vector.shape_cast %112 : vector<32xf32> to vector<1x32xf32>
    %114 = vector.broadcast %109 : vector<1x1xf32> to vector<1x32xf32>
    %115 = arith.mulf %113, %114 : vector<1x32xf32>
    %116 = vector.broadcast %115 : vector<1x32xf32> to vector<16x32xf32>
    %117 = arith.subf %86, %116 : vector<16x32xf32>
    %118 = vector.broadcast %105 : vector<16x1xf32> to vector<16x32xf32>
    %119 = arith.mulf %118, %117 : vector<16x32xf32>
    %120 = arith.mulf %119, %117 : vector<16x32xf32>
    %cst_40 = arith.constant dense<0.000000e+00> : vector<32xf32>
    %121 = vector.multi_reduction <add>, %120, %cst_40 [0] : vector<16x32xf32> to vector<32xf32>
    %122 = vector.shape_cast %121 : vector<32xf32> to vector<1x32xf32>
    %123 = vector.broadcast %109 : vector<1x1xf32> to vector<1x32xf32>
    %124 = arith.mulf %122, %123 : vector<1x32xf32>
    %cst_41 = arith.constant 9.99999974E-6 : f32
    %125 = vector.broadcast %cst_41 : f32 to vector<1x32xf32>
    %126 = arith.addf %124, %125 : vector<1x32xf32>
    %127 = math.rsqrt %126 : vector<1x32xf32>
    %128 = vector.broadcast %127 : vector<1x32xf32> to vector<16x32xf32>
    %129 = arith.mulf %117, %128 : vector<16x32xf32>
    %cst_42 = arith.constant dense<0.000000e+00> : vector<32xf32>
    %130 = vector.multi_reduction <add>, %129, %cst_42 [0] : vector<16x32xf32> to vector<32xf32>
    %131 = vector.shape_cast %130 : vector<32xf32> to vector<1x32xf32>
    %cst_43 = arith.constant 1.600000e+01 : f32
    %132 = vector.broadcast %cst_43 : f32 to vector<1x32xf32>
    %133 = arith.divf %131, %132 : vector<1x32xf32>
    %134 = vector.broadcast %133 : vector<1x32xf32> to vector<16x32xf32>
    %135 = arith.subf %129, %134 : vector<16x32xf32>
    %136 = arith.mulf %135, %135 : vector<16x32xf32>
    %cst_44 = arith.constant dense<0.000000e+00> : vector<32xf32>
    %137 = vector.multi_reduction <add>, %136, %cst_44 [0] : vector<16x32xf32> to vector<32xf32>
    %138 = vector.shape_cast %137 : vector<32xf32> to vector<1x32xf32>
    %cst_45 = arith.constant 1.600000e+01 : f32
    %139 = vector.broadcast %cst_45 : f32 to vector<1x32xf32>
    %140 = arith.divf %138, %139 : vector<1x32xf32>
    %cst_46 = arith.constant 9.99999974E-6 : f32
    %141 = vector.broadcast %cst_46 : f32 to vector<1x32xf32>
    %142 = arith.addf %140, %141 : vector<1x32xf32>
    %143 = math.rsqrt %142 : vector<1x32xf32>
    %144 = vector.broadcast %143 : vector<1x32xf32> to vector<16x32xf32>
    %145 = arith.mulf %135, %144 : vector<16x32xf32>
    %146 = vector.broadcast %14 : vector<1x32xf32> to vector<16x32xf32>
    %147 = arith.mulf %146, %145 : vector<16x32xf32>
    %148 = vector.broadcast %15 : vector<1x32xf32> to vector<16x32xf32>
    %149 = arith.addf %147, %148 : vector<16x32xf32>
    %cst_47 = arith.constant 0.000000e+00 : f32
    %150 = vector.broadcast %cst_47 : f32 to vector<16x32xf32>
    %151 = arith.maximumf %149, %150 : vector<16x32xf32>
    %152 = arith.truncf %151 : vector<16x32xf32> to vector<16x32xbf16>
    %cst_48 = arith.constant dense<0.000000e+00> : vector<16x32xf32>
    %153 = tpu.matmul %152, %16, %cst_48 {dimension_numbers = #tpu.dot_dimension_numbers<[1], [0], [0], [1], [0, 0, 1, 1], [], []>} : vector<16x32xbf16>, vector<32x32xbf16>, vector<16x32xf32> -> vector<16x32xf32>
    %154 = vector.broadcast %17 : vector<1x32xf32> to vector<16x32xf32>
    %155 = arith.addf %153, %154 : vector<16x32xf32>
    %156 = arith.addf %5, %155 : vector<16x32xf32>
    %c208 = arith.constant 208 : index
    %c0_49 = arith.constant 0 : index
    %157 = vector.load %arg2[%c208, %c0_49] : memref<368x32xbf16, #tpu.memory_space<vmem>>, vector<32x2xbf16>
    %c12 = arith.constant 12 : index
    %c0_50 = arith.constant 0 : index
    %158 = vector.load %arg3[%c12, %c0_50] : memref<24x32xf32, #tpu.memory_space<vmem>>, vector<1x2xf32>
    %c13 = arith.constant 13 : index
    %c0_51 = arith.constant 0 : index
    %159 = vector.load %arg3[%c13, %c0_51] : memref<24x32xf32, #tpu.memory_space<vmem>>, vector<1x32xf32>
    %c14 = arith.constant 14 : index
    %c0_52 = arith.constant 0 : index
    %160 = vector.load %arg3[%c14, %c0_52] : memref<24x32xf32, #tpu.memory_space<vmem>>, vector<1x32xf32>
    %c240 = arith.constant 240 : index
    %c0_53 = arith.constant 0 : index
    %161 = vector.load %arg2[%c240, %c0_53] : memref<368x32xbf16, #tpu.memory_space<vmem>>, vector<32x32xbf16>
    %c15 = arith.constant 15 : index
    %c0_54 = arith.constant 0 : index
    %162 = vector.load %arg3[%c15, %c0_54] : memref<24x32xf32, #tpu.memory_space<vmem>>, vector<1x32xf32>
    %c272 = arith.constant 272 : index
    %c0_55 = arith.constant 0 : index
    %163 = vector.load %arg2[%c272, %c0_55] : memref<368x32xbf16, #tpu.memory_space<vmem>>, vector<32x2xbf16>
    %c16_56 = arith.constant 16 : index
    %c0_57 = arith.constant 0 : index
    %164 = vector.load %arg3[%c16_56, %c0_57] : memref<24x32xf32, #tpu.memory_space<vmem>>, vector<1x2xf32>
    %c17 = arith.constant 17 : index
    %c0_58 = arith.constant 0 : index
    %165 = vector.load %arg3[%c17, %c0_58] : memref<24x32xf32, #tpu.memory_space<vmem>>, vector<1x32xf32>
    %c18 = arith.constant 18 : index
    %c0_59 = arith.constant 0 : index
    %166 = vector.load %arg3[%c18, %c0_59] : memref<24x32xf32, #tpu.memory_space<vmem>>, vector<1x32xf32>
    %c304 = arith.constant 304 : index
    %c0_60 = arith.constant 0 : index
    %167 = vector.load %arg2[%c304, %c0_60] : memref<368x32xbf16, #tpu.memory_space<vmem>>, vector<32x32xbf16>
    %c19 = arith.constant 19 : index
    %c0_61 = arith.constant 0 : index
    %168 = vector.load %arg3[%c19, %c0_61] : memref<24x32xf32, #tpu.memory_space<vmem>>, vector<1x32xf32>
    %169 = arith.truncf %156 : vector<16x32xf32> to vector<16x32xbf16>
    %cst_62 = arith.constant dense<0.000000e+00> : vector<16x2xf32>
    %170 = tpu.matmul %169, %157, %cst_62 {dimension_numbers = #tpu.dot_dimension_numbers<[1], [0], [0], [1], [0, 0, 1, 1], [], []>} : vector<16x32xbf16>, vector<32x2xbf16>, vector<16x2xf32> -> vector<16x2xf32>
    %171 = vector.broadcast %158 : vector<1x2xf32> to vector<16x2xf32>
    %172 = arith.addf %170, %171 : vector<16x2xf32>
    %173 = vector.extract_strided_slice %172 {offsets = [0, 0], sizes = [16, 1], strides = [1, 1]} : vector<16x2xf32> to vector<16x1xf32>
    %cst_63 = arith.constant 5.000000e-01 : f32
    %174 = vector.broadcast %cst_63 : f32 to vector<16x1xf32>
    %175 = arith.mulf %174, %173 : vector<16x1xf32>
    %176 = math.tanh %175 : vector<16x1xf32>
    %cst_64 = arith.constant 1.000000e+00 : f32
    %177 = vector.broadcast %cst_64 : f32 to vector<16x1xf32>
    %178 = arith.addf %176, %177 : vector<16x1xf32>
    %cst_65 = arith.constant 5.000000e-01 : f32
    %179 = vector.broadcast %cst_65 : f32 to vector<16x1xf32>
    %180 = arith.mulf %179, %178 : vector<16x1xf32>
    %181 = vector.extract_strided_slice %172 {offsets = [0, 1], sizes = [16, 1], strides = [1, 1]} : vector<16x2xf32> to vector<16x1xf32>
    %cst_66 = arith.constant dense<0xFF800000> : vector<1xf32>
    %182 = vector.multi_reduction <maximumf>, %181, %cst_66 [0] : vector<16x1xf32> to vector<1xf32>
    %183 = vector.shape_cast %182 : vector<1xf32> to vector<1x1xf32>
    %184 = vector.broadcast %183 : vector<1x1xf32> to vector<16x1xf32>
    %185 = arith.subf %181, %184 : vector<16x1xf32>
    %186 = math.exp %185 : vector<16x1xf32>
    %187 = arith.mulf %180, %186 : vector<16x1xf32>
    %cst_67 = arith.constant dense<0.000000e+00> : vector<1xf32>
    %188 = vector.multi_reduction <add>, %187, %cst_67 [0] : vector<16x1xf32> to vector<1xf32>
    %189 = vector.shape_cast %188 : vector<1xf32> to vector<1x1xf32>
    %cst_68 = arith.constant 1.000000e+00 : f32
    %190 = vector.broadcast %cst_68 : f32 to vector<1x1xf32>
    %191 = arith.divf %190, %189 : vector<1x1xf32>
    %192 = vector.broadcast %187 : vector<16x1xf32> to vector<16x32xf32>
    %193 = arith.mulf %156, %192 : vector<16x32xf32>
    %cst_69 = arith.constant dense<0.000000e+00> : vector<32xf32>
    %194 = vector.multi_reduction <add>, %193, %cst_69 [0] : vector<16x32xf32> to vector<32xf32>
    %195 = vector.shape_cast %194 : vector<32xf32> to vector<1x32xf32>
    %196 = vector.broadcast %191 : vector<1x1xf32> to vector<1x32xf32>
    %197 = arith.mulf %195, %196 : vector<1x32xf32>
    %198 = vector.broadcast %197 : vector<1x32xf32> to vector<16x32xf32>
    %199 = arith.subf %156, %198 : vector<16x32xf32>
    %200 = vector.broadcast %187 : vector<16x1xf32> to vector<16x32xf32>
    %201 = arith.mulf %200, %199 : vector<16x32xf32>
    %202 = arith.mulf %201, %199 : vector<16x32xf32>
    %cst_70 = arith.constant dense<0.000000e+00> : vector<32xf32>
    %203 = vector.multi_reduction <add>, %202, %cst_70 [0] : vector<16x32xf32> to vector<32xf32>
    %204 = vector.shape_cast %203 : vector<32xf32> to vector<1x32xf32>
    %205 = vector.broadcast %191 : vector<1x1xf32> to vector<1x32xf32>
    %206 = arith.mulf %204, %205 : vector<1x32xf32>
    %cst_71 = arith.constant 9.99999974E-6 : f32
    %207 = vector.broadcast %cst_71 : f32 to vector<1x32xf32>
    %208 = arith.addf %206, %207 : vector<1x32xf32>
    %209 = math.rsqrt %208 : vector<1x32xf32>
    %210 = vector.broadcast %209 : vector<1x32xf32> to vector<16x32xf32>
    %211 = arith.mulf %199, %210 : vector<16x32xf32>
    %cst_72 = arith.constant dense<0.000000e+00> : vector<32xf32>
    %212 = vector.multi_reduction <add>, %211, %cst_72 [0] : vector<16x32xf32> to vector<32xf32>
    %213 = vector.shape_cast %212 : vector<32xf32> to vector<1x32xf32>
    %cst_73 = arith.constant 1.600000e+01 : f32
    %214 = vector.broadcast %cst_73 : f32 to vector<1x32xf32>
    %215 = arith.divf %213, %214 : vector<1x32xf32>
    %216 = vector.broadcast %215 : vector<1x32xf32> to vector<16x32xf32>
    %217 = arith.subf %211, %216 : vector<16x32xf32>
    %218 = arith.mulf %217, %217 : vector<16x32xf32>
    %cst_74 = arith.constant dense<0.000000e+00> : vector<32xf32>
    %219 = vector.multi_reduction <add>, %218, %cst_74 [0] : vector<16x32xf32> to vector<32xf32>
    %220 = vector.shape_cast %219 : vector<32xf32> to vector<1x32xf32>
    %cst_75 = arith.constant 1.600000e+01 : f32
    %221 = vector.broadcast %cst_75 : f32 to vector<1x32xf32>
    %222 = arith.divf %220, %221 : vector<1x32xf32>
    %cst_76 = arith.constant 9.99999974E-6 : f32
    %223 = vector.broadcast %cst_76 : f32 to vector<1x32xf32>
    %224 = arith.addf %222, %223 : vector<1x32xf32>
    %225 = math.rsqrt %224 : vector<1x32xf32>
    %226 = vector.broadcast %225 : vector<1x32xf32> to vector<16x32xf32>
    %227 = arith.mulf %217, %226 : vector<16x32xf32>
    %228 = vector.broadcast %159 : vector<1x32xf32> to vector<16x32xf32>
    %229 = arith.mulf %228, %227 : vector<16x32xf32>
    %230 = vector.broadcast %160 : vector<1x32xf32> to vector<16x32xf32>
    %231 = arith.addf %229, %230 : vector<16x32xf32>
    %cst_77 = arith.constant 0.000000e+00 : f32
    %232 = vector.broadcast %cst_77 : f32 to vector<16x32xf32>
    %233 = arith.maximumf %231, %232 : vector<16x32xf32>
    %234 = arith.truncf %233 : vector<16x32xf32> to vector<16x32xbf16>
    %cst_78 = arith.constant dense<0.000000e+00> : vector<16x32xf32>
    %235 = tpu.matmul %234, %161, %cst_78 {dimension_numbers = #tpu.dot_dimension_numbers<[1], [0], [0], [1], [0, 0, 1, 1], [], []>} : vector<16x32xbf16>, vector<32x32xbf16>, vector<16x32xf32> -> vector<16x32xf32>
    %236 = vector.broadcast %162 : vector<1x32xf32> to vector<16x32xf32>
    %237 = arith.addf %235, %236 : vector<16x32xf32>
    %238 = arith.truncf %237 : vector<16x32xf32> to vector<16x32xbf16>
    %cst_79 = arith.constant dense<0.000000e+00> : vector<16x2xf32>
    %239 = tpu.matmul %238, %163, %cst_79 {dimension_numbers = #tpu.dot_dimension_numbers<[1], [0], [0], [1], [0, 0, 1, 1], [], []>} : vector<16x32xbf16>, vector<32x2xbf16>, vector<16x2xf32> -> vector<16x2xf32>
    %240 = vector.broadcast %164 : vector<1x2xf32> to vector<16x2xf32>
    %241 = arith.addf %239, %240 : vector<16x2xf32>
    %242 = vector.extract_strided_slice %241 {offsets = [0, 0], sizes = [16, 1], strides = [1, 1]} : vector<16x2xf32> to vector<16x1xf32>
    %cst_80 = arith.constant 5.000000e-01 : f32
    %243 = vector.broadcast %cst_80 : f32 to vector<16x1xf32>
    %244 = arith.mulf %243, %242 : vector<16x1xf32>
    %245 = math.tanh %244 : vector<16x1xf32>
    %cst_81 = arith.constant 1.000000e+00 : f32
    %246 = vector.broadcast %cst_81 : f32 to vector<16x1xf32>
    %247 = arith.addf %245, %246 : vector<16x1xf32>
    %cst_82 = arith.constant 5.000000e-01 : f32
    %248 = vector.broadcast %cst_82 : f32 to vector<16x1xf32>
    %249 = arith.mulf %248, %247 : vector<16x1xf32>
    %250 = vector.extract_strided_slice %241 {offsets = [0, 1], sizes = [16, 1], strides = [1, 1]} : vector<16x2xf32> to vector<16x1xf32>
    %cst_83 = arith.constant dense<0xFF800000> : vector<1xf32>
    %251 = vector.multi_reduction <maximumf>, %250, %cst_83 [0] : vector<16x1xf32> to vector<1xf32>
    %252 = vector.shape_cast %251 : vector<1xf32> to vector<1x1xf32>
    %253 = vector.broadcast %252 : vector<1x1xf32> to vector<16x1xf32>
    %254 = arith.subf %250, %253 : vector<16x1xf32>
    %255 = math.exp %254 : vector<16x1xf32>
    %256 = arith.mulf %249, %255 : vector<16x1xf32>
    %cst_84 = arith.constant dense<0.000000e+00> : vector<1xf32>
    %257 = vector.multi_reduction <add>, %256, %cst_84 [0] : vector<16x1xf32> to vector<1xf32>
    %258 = vector.shape_cast %257 : vector<1xf32> to vector<1x1xf32>
    %cst_85 = arith.constant 1.000000e+00 : f32
    %259 = vector.broadcast %cst_85 : f32 to vector<1x1xf32>
    %260 = arith.divf %259, %258 : vector<1x1xf32>
    %261 = vector.broadcast %256 : vector<16x1xf32> to vector<16x32xf32>
    %262 = arith.mulf %237, %261 : vector<16x32xf32>
    %cst_86 = arith.constant dense<0.000000e+00> : vector<32xf32>
    %263 = vector.multi_reduction <add>, %262, %cst_86 [0] : vector<16x32xf32> to vector<32xf32>
    %264 = vector.shape_cast %263 : vector<32xf32> to vector<1x32xf32>
    %265 = vector.broadcast %260 : vector<1x1xf32> to vector<1x32xf32>
    %266 = arith.mulf %264, %265 : vector<1x32xf32>
    %267 = vector.broadcast %266 : vector<1x32xf32> to vector<16x32xf32>
    %268 = arith.subf %237, %267 : vector<16x32xf32>
    %269 = vector.broadcast %256 : vector<16x1xf32> to vector<16x32xf32>
    %270 = arith.mulf %269, %268 : vector<16x32xf32>
    %271 = arith.mulf %270, %268 : vector<16x32xf32>
    %cst_87 = arith.constant dense<0.000000e+00> : vector<32xf32>
    %272 = vector.multi_reduction <add>, %271, %cst_87 [0] : vector<16x32xf32> to vector<32xf32>
    %273 = vector.shape_cast %272 : vector<32xf32> to vector<1x32xf32>
    %274 = vector.broadcast %260 : vector<1x1xf32> to vector<1x32xf32>
    %275 = arith.mulf %273, %274 : vector<1x32xf32>
    %cst_88 = arith.constant 9.99999974E-6 : f32
    %276 = vector.broadcast %cst_88 : f32 to vector<1x32xf32>
    %277 = arith.addf %275, %276 : vector<1x32xf32>
    %278 = math.rsqrt %277 : vector<1x32xf32>
    %279 = vector.broadcast %278 : vector<1x32xf32> to vector<16x32xf32>
    %280 = arith.mulf %268, %279 : vector<16x32xf32>
    %cst_89 = arith.constant dense<0.000000e+00> : vector<32xf32>
    %281 = vector.multi_reduction <add>, %280, %cst_89 [0] : vector<16x32xf32> to vector<32xf32>
    %282 = vector.shape_cast %281 : vector<32xf32> to vector<1x32xf32>
    %cst_90 = arith.constant 1.600000e+01 : f32
    %283 = vector.broadcast %cst_90 : f32 to vector<1x32xf32>
    %284 = arith.divf %282, %283 : vector<1x32xf32>
    %285 = vector.broadcast %284 : vector<1x32xf32> to vector<16x32xf32>
    %286 = arith.subf %280, %285 : vector<16x32xf32>
    %287 = arith.mulf %286, %286 : vector<16x32xf32>
    %cst_91 = arith.constant dense<0.000000e+00> : vector<32xf32>
    %288 = vector.multi_reduction <add>, %287, %cst_91 [0] : vector<16x32xf32> to vector<32xf32>
    %289 = vector.shape_cast %288 : vector<32xf32> to vector<1x32xf32>
    %cst_92 = arith.constant 1.600000e+01 : f32
    %290 = vector.broadcast %cst_92 : f32 to vector<1x32xf32>
    %291 = arith.divf %289, %290 : vector<1x32xf32>
    %cst_93 = arith.constant 9.99999974E-6 : f32
    %292 = vector.broadcast %cst_93 : f32 to vector<1x32xf32>
    %293 = arith.addf %291, %292 : vector<1x32xf32>
    %294 = math.rsqrt %293 : vector<1x32xf32>
    %295 = vector.broadcast %294 : vector<1x32xf32> to vector<16x32xf32>
    %296 = arith.mulf %286, %295 : vector<16x32xf32>
    %297 = vector.broadcast %165 : vector<1x32xf32> to vector<16x32xf32>
    %298 = arith.mulf %297, %296 : vector<16x32xf32>
    %299 = vector.broadcast %166 : vector<1x32xf32> to vector<16x32xf32>
    %300 = arith.addf %298, %299 : vector<16x32xf32>
    %cst_94 = arith.constant 0.000000e+00 : f32
    %301 = vector.broadcast %cst_94 : f32 to vector<16x32xf32>
    %302 = arith.maximumf %300, %301 : vector<16x32xf32>
    %303 = arith.truncf %302 : vector<16x32xf32> to vector<16x32xbf16>
    %cst_95 = arith.constant dense<0.000000e+00> : vector<16x32xf32>
    %304 = tpu.matmul %303, %167, %cst_95 {dimension_numbers = #tpu.dot_dimension_numbers<[1], [0], [0], [1], [0, 0, 1, 1], [], []>} : vector<16x32xbf16>, vector<32x32xbf16>, vector<16x32xf32> -> vector<16x32xf32>
    %305 = vector.broadcast %168 : vector<1x32xf32> to vector<16x32xf32>
    %306 = arith.addf %304, %305 : vector<16x32xf32>
    %307 = arith.addf %156, %306 : vector<16x32xf32>
    %c336 = arith.constant 336 : index
    %c0_96 = arith.constant 0 : index
    %308 = vector.load %arg2[%c336, %c0_96] : memref<368x32xbf16, #tpu.memory_space<vmem>>, vector<32x1xbf16>
    %309 = arith.truncf %307 : vector<16x32xf32> to vector<16x32xbf16>
    %cst_97 = arith.constant dense<0.000000e+00> : vector<16x1xf32>
    %310 = tpu.matmul %309, %308, %cst_97 {dimension_numbers = #tpu.dot_dimension_numbers<[1], [0], [0], [1], [0, 0, 1, 1], [], []>} : vector<16x32xbf16>, vector<32x1xbf16>, vector<16x1xf32> -> vector<16x1xf32>
    %c20 = arith.constant 20 : index
    %c0_98 = arith.constant 0 : index
    %311 = vector.load %arg3[%c20, %c0_98] : memref<24x32xf32, #tpu.memory_space<vmem>>, vector<1x1xf32>
    %312 = vector.broadcast %311 : vector<1x1xf32> to vector<16x1xf32>
    %313 = arith.addf %310, %312 : vector<16x1xf32>
    %c0_99 = arith.constant 0 : index
    %c0_100 = arith.constant 0 : index
    %314 = vector.load %arg4[%c0_99, %c0_100] : memref<16x1xf32, #tpu.memory_space<vmem>>, vector<16x1xf32>
    tpu.vector_store %arg4[%c0_99, %c0_100], %313 {strides = array<i32>} : memref<16x1xf32, #tpu.memory_space<vmem>>, vector<16x1xf32>,
    return
  }
  func.func @transform_0(%arg0: i32) -> (i32, i32) {
    %c0_i32 = arith.constant 0 : i32
    %c0_i32_0 = arith.constant 0 : i32
    return %arg0, %c0_i32 : i32, i32
  }
  func.func @transform_1(%arg0: i32) -> (i32, i32) {
    %c0_i32 = arith.constant 0 : i32
    %c0_i32_0 = arith.constant 0 : i32
    %c0_i32_1 = arith.constant 0 : i32
    return %c0_i32, %c0_i32_0 : i32, i32
  }
  func.func @transform_2(%arg0: i32) -> (i32, i32) {
    %c0_i32 = arith.constant 0 : i32
    %c0_i32_0 = arith.constant 0 : i32
    %c0_i32_1 = arith.constant 0 : i32
    return %c0_i32, %c0_i32_0 : i32, i32
  }
  func.func @transform_3(%arg0: i32) -> (i32, i32) {
    %c0_i32 = arith.constant 0 : i32
    %c0_i32_0 = arith.constant 0 : i32
    return %arg0, %c0_i32 : i32, i32
  }
}

</mosaic_0001>

<bundles_post_ra>
// kernel: neg.1
= control target key start
LH: loop header
LB: loop body
LE: loop exit
PB: predicated region body
PF: predicated region fallthrough
CT: control target
= control target key end

     0   :  { %s72_s0 = inlined_call_operand.vmem [shape: f32[2,16,16], index: 0, kind: input, shape index: {}]   ;;  %s73_s1 = inlined_call_operand.vmem [shape: f32[2,16,16], index: 1, kind: output, shape index: {}]  }
   0x1   :  { %v2_v0 = vld [vmem:[%s72_s0] sm:$0xff]  ;;  %v32_v1 = vld [vmem:[%s72_s0 + $0x10] sm:$0xff]  ;;  %v34_v2 = vld [vmem:[%s72_s0 + $0x8] sm:$0xff] }
   0x2   :  { %v5_v3 = vxor.u32 2147483648, %v2_v0  ;;  %v12_v4 = vxor.u32 2147483648, %v32_v1  ;;  %v20_v5 = vxor.u32 2147483648, %v34_v2  ;;  %v36_v6 = vld [vmem:[%s72_s0 + $0x18] sm:$0xff] }
   0x3   :  { %v28_v7 = vxor.u32 2147483648, %v36_v6 }
   0x4   :  { %7 = vst [vmem:[%s73_s1] sm:$0xff] %v5_v3 }
   0x5   :  { %33 = vst [vmem:[%s73_s1 + $0x10] sm:$0xff] %v12_v4 }
   0x6   :  { %35 = vst [vmem:[%s73_s1 + $0x8] sm:$0xff] %v20_v5 }
   0x7   :  { %37 = vst [vmem:[%s73_s1 + $0x18] sm:$0xff] %v28_v7 }

// kernel: lmc_forward.2
= control target key start
LH: loop header
LB: loop body
LE: loop exit
PB: predicated region body
PF: predicated region fallthrough
CT: control target
= control target key end

     0   :  { %s301_s22 = smov 126   ;;  %s302_s23 = smov 2   ;;  %vm78_vm0 = vcmask 1042432   ;;  %vm61_vm1 = vcmask 15360   ;;  %vm71_vm2 = vcmask 48128   ;;  %v303_v37 = vmov 16.0   ;;  %s380_s0 = inlined_call_operand.vmem [shape: f32[32,4], index: 0, kind: input, shape index: {}]   ;;  %s381_s2 = inlined_call_operand.vmem [shape: f32[24,32], index: 2, kind: input, shape index: {}]   ;;  %s382_s1 = inlined_call_operand.vmem [shape: bf16[368,32], index: 1, kind: input, shape index: {}]   ;;  %s383_s3 = inlined_call_operand.vmem [shape: bf16[32,8], index: 3, kind: output, shape index: {}]  }
   0x1   :  { %v18_v0 = vld [vmem:[%s380_s0 + $0x10] sm:$0xff]  ;;  %v16_v2 = vld [vmem:[%s380_s0] sm:$0xff]  ;;  %v17_v3 = vld [vmem:[%s380_s0 + $0x8] sm:$0xff]  ;;  %291 = vrcp.f32 %v303_v37  ;;  %vm101_vm3 = vcmask 64512   ;;  %vm261_vm15 = vcmask 60416  }
   0x2   :  { %v287_v1 = vld [vmem:[%s381_s2 + $0x15] ss:$0 sm:$0xff]  ;;  %v19_v7 = vld [vmem:[%s380_s0 + $0x18] sm:$0xff]  ;;  %v66_v15 = vld [vmem:[%s382_s1] sm:$0x7] }
   0x3   :  { %v23_v4 = vsub.f32 %v18_v0, %v287_v1  ;;  %v21_v5 = vsub.f32 %v16_v2, %v287_v1  ;;  %v22_v6 = vsub.f32 %v17_v3, %v287_v1  ;;  %v24_v11 = vsub.f32 %v19_v7, %v287_v1  ;;  %v288_v41 = vld [vmem:[%s381_s2] ss:$0 sm:$0xff] }
   0x4   :  { %v80_v16 = vsel %vm78_vm0, %v66_v15, 0 }
   0x5   :  { %v27_v8 = vmul.f32 0.00095238094, %v23_v4  ;;  %v25_v9 = vmul.f32 0.00095238094, %v21_v5  ;;  %v26_v10 = vmul.f32 0.00095238094, %v22_v6  ;;  %89 = vmatpush.bf16.msra.mxu0 %v80_v16  ;;  %272 = vmatpush.bf16.msra.mxu1 %v80_v16 }
   0x6   :  { %v28_v13 = vmul.f32 0.00095238094, %v24_v11 }
   0x7   :  { %37 = vrot.lane.b32.xlu1 %v27_v8, %s301_s22  ;;  %33 = vrot.lane.b32.xlu0 %v25_v9, %s301_s22  ;;  %v277_v12 = vpack.i.bf16 %v26_v10, %v25_v9  ;;  %v292_v40 = vpop.eup %291 }
   0x8   :  { %v282_v14 = vpack.i.bf16 %v28_v13, %v27_v8  ;;  %v121_v42 = vmul.f32 16.0, %v292_v40  ;;  %vm125_vm4 = vweird.f32 %v292_v40 }
   0x9   :  { %278 = vrot.lane.b32.xlu2 %v277_v12, %s302_s23 }
   0xa   :  { %v122_v49 = vsub.f32 1.0, %v121_v42 }
   0xc   :  { %v123_v58 = vmul.f32 %v292_v40, %v122_v49 }
   0xe   :  { %v124_v63 = vadd.f32 %v292_v40, %v123_v58 }
   0xf   :  { %39 = vrot.lane.b32.xlu1 %v28_v13, %s301_s22  ;;  %35 = vrot.lane.b32.xlu0 %v26_v10, %s301_s22 }
  0x10   :  { %v126_v4 = vsel %vm125_vm4, %v292_v40, %v124_v63 }
  0x11   :  { %283 = vrot.lane.b32.xlu2 %v282_v14, %s302_s23 }
  0x63   :  { %v279_v17 = vpop.permute.xlu2 %278 }
  0x64   :  { %v280_v21 = vunpack.i.l.bf16 %v279_v17  ;;  %v281_v28 = vunpack.i.h.bf16 %v279_v17 }
  0x6b   :  { %v284_v20 = vpop.permute.xlu2 %283 }
  0x6c   :  { %v286_v24 = vunpack.i.h.bf16 %v284_v20  ;;  %v285_v25 = vunpack.i.l.bf16 %v284_v20 }
  0x79   :  { %v38_v18 = vpop.permute.xlu1 %37  ;;  %v34_v19 = vpop.permute.xlu0 %33 }
  0x7a   :  { %v47_v22 = vsub.f32 %v27_v8, %v38_v18  ;;  %v45_v23 = vsub.f32 %v25_v9, %v34_v19 }
  0x7c   :  { %v62_v31 = vsel %vm61_vm1, %v45_v23, %v280_v21  ;;  %v64_v33 = vsel %vm61_vm1, %v47_v22, %v285_v25 }
  0x81   :  { %v40_v26 = vpop.permute.xlu1 %39  ;;  %v36_v27 = vpop.permute.xlu0 %35 }
  0x82   :  { %v48_v29 = vsub.f32 %v28_v13, %v40_v26  ;;  %v46_v30 = vsub.f32 %v26_v10, %v36_v27 }
  0x84   :  { %v63_v32 = vsel %vm61_vm1, %v46_v30, %v281_v28  ;;  %v65_v34 = vsel %vm61_vm1, %v48_v29, %v286_v24 }
  0x85   :  { %v68_v35 = vpack.c.bf16 %v63_v32, %v62_v31  ;;  %v69_v36 = vpack.c.bf16 %v65_v34, %v64_v33 }
  0x87   :  { %270 = vmatmul.msk.bf16.vlgmr.msra.gmra.mxu0 %vm71_vm2, %v68_v35  ;;  %271 = vmatmul.msk.bf16.vlgmr.msra.gmra.mxu1 %vm71_vm2, %v69_v36 }
 0x104   :  { %v91_v38 = vpop.f32.mrf.mxu0  ;;  %v96_v39 = vpop.f32.mrf.mxu1 }
 0x105   :  { %v92_v43 = vadd.f32 %v288_v41, %v91_v38  ;;  %v97_v44 = vadd.f32 %v288_v41, %v96_v39 }
 0x107   :  { %v102_v50 = vsel %vm101_vm3, %v92_v43, 0.0  ;;  %v111_v51 = vsel %vm101_vm3, %v97_v44, 0.0 }
 0x10c   :  { %v93_v45 = vpop.f32.mrf.mxu0  ;;  %v98_v46 = vpop.f32.mrf.mxu1 }
 0x10d   :  { %v94_v47 = vadd.f32 %v288_v41, %v93_v45  ;;  %v99_v48 = vadd.f32 %v288_v41, %v98_v46  ;;  %v304_v46 = vmov 32.0  }
 0x10f   :  { %v103_v52 = vsel %vm101_vm3, %v94_v47, 0.0  ;;  %v112_v53 = vsel %vm101_vm3, %v99_v48, 0.0 }
 0x110   :  { %v104_v54 = vadd.f32 %v103_v52, %v102_v50  ;;  %v113_v55 = vadd.f32 %v112_v53, %v111_v51 }
 0x112   :  { %v105_v56 = vrot.slane %v104_v54, 4  ;;  %v114_v57 = vrot.slane %v113_v55, 4 }
 0x114   :  { %v106_v59 = vadd.f32 %v105_v56, %v104_v54  ;;  %v115_v60 = vadd.f32 %v114_v57, %v113_v55 }
 0x116   :  { %v107_v61 = vrot.slane %v106_v59, 2  ;;  %v116_v62 = vrot.slane %v115_v60, 2 }
 0x118   :  { %v108_v0 = vadd.f32 %v107_v61, %v106_v59  ;;  %v117_v1 = vadd.f32 %v116_v62, %v115_v60 }
 0x11a   :  { %v109_v2 = vrot.slane %v108_v0, 1  ;;  %v118_v3 = vrot.slane %v117_v1, 1 }
 0x11c   :  { %v110_v5 = vadd.f32 %v109_v2, %v108_v0  ;;  %v119_v6 = vadd.f32 %v118_v3, %v117_v1 }
 0x11e   :  { %v127_v7 = vmul.f32 %v126_v4, %v110_v5  ;;  %v128_v8 = vmul.f32 %v126_v4, %v119_v6 }
 0x120   :  { %v129_v9 = vsub.f32 %v92_v43, %v127_v7  ;;  %v130_v10 = vsub.f32 %v94_v47, %v127_v7  ;;  %v131_v11 = vsub.f32 %v97_v44, %v128_v8  ;;  %v132_v12 = vsub.f32 %v99_v48, %v128_v8 }
 0x122   :  { %v133_v13 = vmul.f32 %v129_v9, %v129_v9  ;;  %v134_v14 = vmul.f32 %v130_v10, %v130_v10  ;;  %v135_v15 = vmul.f32 %v131_v11, %v131_v11  ;;  %v136_v16 = vmul.f32 %v132_v12, %v132_v12 }
 0x124   :  { %v137_v17 = vsel %vm101_vm3, %v133_v13, 0.0  ;;  %v138_v18 = vsel %vm101_vm3, %v134_v14, 0.0  ;;  %v146_v19 = vsel %vm101_vm3, %v135_v15, 0.0  ;;  %v147_v20 = vsel %vm101_vm3, %v136_v16, 0.0 }
 0x125   :  { %v139_v21 = vadd.f32 %v138_v18, %v137_v17  ;;  %v148_v22 = vadd.f32 %v147_v20, %v146_v19 }
 0x127   :  { %v140_v23 = vrot.slane %v139_v21, 4  ;;  %v149_v24 = vrot.slane %v148_v22, 4 }
 0x129   :  { %v141_v25 = vadd.f32 %v140_v23, %v139_v21  ;;  %v150_v26 = vadd.f32 %v149_v24, %v148_v22 }
 0x12b   :  { %v142_v27 = vrot.slane %v141_v25, 2  ;;  %v151_v28 = vrot.slane %v150_v26, 2 }
 0x12d   :  { %v143_v29 = vadd.f32 %v142_v27, %v141_v25  ;;  %v152_v30 = vadd.f32 %v151_v28, %v150_v26 }
 0x12f   :  { %v144_v31 = vrot.slane %v143_v29, 1  ;;  %v153_v32 = vrot.slane %v152_v30, 1 }
 0x131   :  { %v145_v33 = vadd.f32 %v144_v31, %v143_v29  ;;  %v154_v34 = vadd.f32 %v153_v32, %v152_v30 }
 0x133   :  { %v155_v35 = vmul.f32 %v145_v33, %v126_v4  ;;  %v156_v36 = vmul.f32 %v154_v34, %v126_v4 }
 0x135   :  { %v157_v37 = vadd.f32 1e-05, %v155_v35  ;;  %v158_v38 = vadd.f32 1e-05, %v156_v36 }
 0x137   :  { %293 = vrsqrt.f32 %v157_v37  ;;  %vm165_vm7 = vweird.f32 %v157_v37  ;;  %vm175_vm9 = vweird.f32 %v158_v38 }
 0x138   :  { %295 = vrsqrt.f32 %v158_v38 }
 0x139   :  { %297 = vrcp.f32 %v304_v46 }
 0x13d   :  { %v294_v39 = vpop.eup %293 }
 0x13e   :  { %v296_v40 = vpop.eup %295  ;;  %v160_v41 = vmul.f32 %v294_v39, %v157_v37  ;;  %vm166_vm5 = vweird.f32 %v294_v39 }
 0x13f   :  { %v170_v42 = vmul.f32 %v296_v40, %v158_v38  ;;  %vm176_vm6 = vweird.f32 %v296_v40  ;;  %vm167_vm8 = vmor %vm165_vm7, %vm166_vm5  ;;  %v298_v52 = vpop.eup %297 }
 0x140   :  { %v161_v43 = vmul.f32 %v294_v39, %v160_v41  ;;  %vm177_vm10 = vmor %vm175_vm9, %vm176_vm6  ;;  %v199_v61 = vmul.f32 32.0, %v298_v52  ;;  %vm203_vm11 = vweird.f32 %v298_v52 }
 0x141   :  { %v171_v44 = vmul.f32 %v296_v40, %v170_v42 }
 0x142   :  { %v162_v45 = vmul.f32 0.5, %v161_v43  ;;  %v200_v2 = vsub.f32 1.0, %v199_v61  ;;  %v289_v43 = vld [vmem:[%s381_s2 + $0x1] ss:$0 sm:$0xff] }
 0x143   :  { %v172_v47 = vmul.f32 0.5, %v171_v44 }
 0x144   :  { %v163_v48 = vsub.f32 1.5, %v162_v45  ;;  %v201_v5 = vmul.f32 %v298_v52, %v200_v2 }
 0x145   :  { %v173_v49 = vsub.f32 1.5, %v172_v47 }
 0x146   :  { %v164_v50 = vmul.f32 %v294_v39, %v163_v48  ;;  %v202_v8 = vadd.f32 %v298_v52, %v201_v5 }
 0x147   :  { %v174_v51 = vmul.f32 %v296_v40, %v173_v49  ;;  %v290_v49 = vld [vmem:[%s381_s2 + $0x2] ss:$0 sm:$0xff] }
 0x148   :  { %v168_v53 = vsel %vm167_vm8, %v294_v39, %v164_v50 }
 0x149   :  { %v179_v54 = vmul.f32 %v168_v53, %v129_v9  ;;  %v180_v55 = vmul.f32 %v168_v53, %v130_v10  ;;  %v178_v56 = vsel %vm177_vm10, %v296_v40, %v174_v51 }
 0x14a   :  { %v181_v57 = vmul.f32 %v178_v56, %v131_v11  ;;  %v182_v60 = vmul.f32 %v178_v56, %v132_v12  ;;  %v204_v11 = vsel %vm203_vm11, %v298_v52, %v202_v8 }
 0x14b   :  { %v185_v58 = vsel %vm101_vm3, %v179_v54, 0.0  ;;  %v186_v59 = vsel %vm101_vm3, %v180_v55, 0.0 }
 0x14c   :  { %v187_v62 = vadd.f32 %v186_v59, %v185_v58  ;;  %v188_v63 = vsel %vm101_vm3, %v181_v57, 0.0  ;;  %v190_v1 = vsel %vm101_vm3, %v182_v60, 0.0 }
 0x14e   :  { %v189_v0 = vadd.f32 %v188_v63, %v187_v62 }
 0x150   :  { %v191_v3 = vadd.f32 %v190_v1, %v189_v0 }
 0x152   :  { %v192_v4 = vrot.slane %v191_v3, 4 }
 0x154   :  { %v193_v6 = vadd.f32 %v192_v4, %v191_v3 }
 0x156   :  { %v194_v7 = vrot.slane %v193_v6, 2 }
 0x158   :  { %v195_v9 = vadd.f32 %v194_v7, %v193_v6 }
 0x15a   :  { %v196_v10 = vrot.slane %v195_v9, 1 }
 0x15c   :  { %v197_v13 = vadd.f32 %v196_v10, %v195_v9 }
 0x15e   :  { %v205_v12 = vmul.f32 %v204_v11, %v197_v13 }
 0x160   :  { %v206_v14 = vsub.f32 %v179_v54, %v205_v12  ;;  %v207_v15 = vsub.f32 %v180_v55, %v205_v12  ;;  %v208_v16 = vsub.f32 %v181_v57, %v205_v12  ;;  %v209_v17 = vsub.f32 %v182_v60, %v205_v12 }
 0x162   :  { %v210_v18 = vmul.f32 %v206_v14, %v206_v14  ;;  %v211_v19 = vmul.f32 %v207_v15, %v207_v15  ;;  %v212_v20 = vmul.f32 %v208_v16, %v208_v16  ;;  %v213_v21 = vmul.f32 %v209_v17, %v209_v17 }
 0x164   :  { %v214_v22 = vsel %vm101_vm3, %v210_v18, 0.0  ;;  %v215_v23 = vsel %vm101_vm3, %v211_v19, 0.0  ;;  %v217_v25 = vsel %vm101_vm3, %v212_v20, 0.0  ;;  %v219_v27 = vsel %vm101_vm3, %v213_v21, 0.0 }
 0x165   :  { %v216_v24 = vadd.f32 %v215_v23, %v214_v22 }
 0x167   :  { %v218_v26 = vadd.f32 %v217_v25, %v216_v24 }
 0x169   :  { %v220_v28 = vadd.f32 %v219_v27, %v218_v26 }
 0x16b   :  { %v221_v29 = vrot.slane %v220_v28, 4 }
 0x16d   :  { %v222_v30 = vadd.f32 %v221_v29, %v220_v28 }
 0x16f   :  { %v223_v31 = vrot.slane %v222_v30, 2 }
 0x171   :  { %v224_v32 = vadd.f32 %v223_v31, %v222_v30 }
 0x173   :  { %v225_v33 = vrot.slane %v224_v32, 1 }
 0x175   :  { %v226_v34 = vadd.f32 %v225_v33, %v224_v32 }
 0x177   :  { %v227_v35 = vmul.f32 %v226_v34, %v204_v11 }
 0x179   :  { %v228_v36 = vadd.f32 1e-05, %v227_v35 }
 0x17b   :  { %299 = vrsqrt.f32 %v228_v36  ;;  %vm235_vm13 = vweird.f32 %v228_v36 }
 0x181   :  { %v300_v37 = vpop.eup %299 }
 0x182   :  { %v230_v38 = vmul.f32 %v300_v37, %v228_v36  ;;  %vm236_vm12 = vweird.f32 %v300_v37 }
 0x183   :  { %vm237_vm14 = vmor %vm235_vm13, %vm236_vm12 }
 0x184   :  { %v231_v39 = vmul.f32 %v300_v37, %v230_v38 }
 0x186   :  { %v232_v40 = vmul.f32 0.5, %v231_v39 }
 0x188   :  { %v233_v41 = vsub.f32 1.5, %v232_v40 }
 0x18a   :  { %v234_v42 = vmul.f32 %v300_v37, %v233_v41 }
 0x18c   :  { %v238_v44 = vsel %vm237_vm14, %v300_v37, %v234_v42 }
 0x18d   :  { %v239_v45 = vmul.f32 %v238_v44, %v206_v14  ;;  %v240_v46 = vmul.f32 %v238_v44, %v207_v15  ;;  %v241_v47 = vmul.f32 %v238_v44, %v208_v16  ;;  %v242_v48 = vmul.f32 %v238_v44, %v209_v17 }
 0x18f   :  { %v244_v50 = vmul.f32 %v289_v43, %v239_v45  ;;  %v245_v51 = vmul.f32 %v289_v43, %v240_v46  ;;  %v246_v52 = vmul.f32 %v289_v43, %v241_v47  ;;  %v247_v53 = vmul.f32 %v289_v43, %v242_v48 }
 0x191   :  { %v249_v54 = vadd.f32 %v290_v49, %v244_v50  ;;  %v250_v55 = vadd.f32 %v290_v49, %v245_v51  ;;  %v251_v56 = vadd.f32 %v290_v49, %v246_v52  ;;  %v252_v57 = vadd.f32 %v290_v49, %v247_v53 }
 0x193   :  { %v253_v58 = vmax.f32 %v249_v54, 0.0  ;;  %v254_v59 = vmax.f32 %v250_v55, 0.0  ;;  %v255_v60 = vmax.f32 %v251_v56, 0.0  ;;  %v256_v61 = vmax.f32 %v252_v57, 0.0 }
 0x195   :  { %v257_v62 = vpack.c.bf16 %v253_v58, %v253_v58  ;;  %v258_v63 = vpack.c.bf16 %v254_v59, %v254_v59  ;;  %v259_v0 = vpack.c.bf16 %v255_v60, %v255_v60  ;;  %v260_v1 = vpack.c.bf16 %v256_v61, %v256_v61 }
 0x197   :  { %262 = vst.msk [vmem:[%s383_s3] sm:$0xf] %vm261_vm15, %v257_v62 }
 0x198   :  { %263 = vst.msk [vmem:[%s383_s3 + $0x4] sm:$0xf] %vm261_vm15, %v258_v63 }
 0x199   :  { %264 = vst.msk [vmem:[%s383_s3 + $0x8] sm:$0xf] %vm261_vm15, %v259_v0 }
 0x19a   :  { %265 = vst.msk [vmem:[%s383_s3 + $0xc] sm:$0xf] %vm261_vm15, %v260_v1 }

// kernel: lmc_forward.3
= control target key start
LH: loop header
LB: loop body
LE: loop exit
PB: predicated region body
PF: predicated region fallthrough
CT: control target
= control target key end

     0   :  { %s1527_s12 = smov 0   ;;  %s1789_s0 = inlined_call_operand.vmem [shape: bf16[32,64], index: 0, kind: input, shape index: {}]   ;;  %s1790_s1 = inlined_call_operand.vmem [shape: bf16[368,32], index: 1, kind: input, shape index: {}]   ;;  %s1791_s2 = inlined_call_operand.vmem [shape: f32[24,32], index: 2, kind: input, shape index: {}]   ;;  %s1792_s3 = inlined_call_operand.vmem [shape: f32[32,1], index: 3, kind: output, shape index: {}]  }
   0x1 LB: > { %s1270_s13 = sadd.s32 4294967295, %s1502_s12   ;;  %p1274_p0 = scmp.ge.s32.totalorder %s1502_s12, 1  ;;  %s1502_s12 = sphi %s1527_s12, %s13_s12  }
   0x2   : > { %p138_p1 = scmp.lt.s32.totalorder %s1502_s12, 3 }
   0x4   : > { %p139_p2 = pnand %p1274_p0, %p138_p1 }
   0x5   : > { %s1275_s16 = sshll.u32 (!%p139_p2), %s1270_s13, 1  ;;  %s1504_s8 = smov (!%p139_p2), 127  }
   0x6   : > { %142 = sbr.rel (%p139_p2) target bundleno = 3031 (0xbd7), region = 32  ;;  %p163_p3 = scmp.lt.s32.totalorder (!%p139_p2), %s1275_s16, 3 }
   0xb   : > { %v1387_v0 = vld [vmem:[%s1790_s1 + $0x20] sm:$0xff]  ;;  %v1386_v1 = vld [vmem:[%s1790_s1 + $0x18] sm:$0xff]  ;;  %s1794_s16 = smov (!%p163_p3, %s1275_s16), 3  ;;  %v1385_v2 = vld [vmem:[%s1790_s1 + $0x10] sm:$0xff]  ;;  %vm216_vm0 = vcmask 523264   ;;  %vm272_vm1 = vcmask 261120  }
   0xc   : > { %224 = vmatpush.bf16.msra.mxu0 %v1387_v0  ;;  %s1276_s21 = sshll.u32 %s1794_s16, 2  ;;  %v1384_v3 = vld [vmem:[%s1790_s1 + $0x8] sm:$0xff]  ;;  %v1389_v5 = vld [vmem:[%s1790_s1 + $0x30] sm:$0xff]  ;;  %v1420_v8 = vld [vmem:[%s1791_s2 + $0x3] ss:$0 sm:$0xff]  ;;  %vm298_vm2 = vcmask 15368  }
   0xd   : > { %s166_s26 = scalar_lea.vmem %s1789_s0, %s1276_s21  ;;  %282 = vmatpush.bf16.msra.mxu1 %v1389_v5  ;;  %v1388_v6 = vld [vmem:[%s1790_s1 + $0x28] sm:$0xff]  ;;  %v1421_v14 = vld [vmem:[%s1791_s2 + $0x4] ss:$0 sm:$0xff]  ;;  %v1505_v33 = vmov 0   ;;  %vm324_vm3 = vcmask 7168   ;;  %s1278_s24 = sshll.u32 %s1794_s16, 3 }
   0xe   : > { %v1383_v4 = vld [vmem:[%s166_s26] sm:$0xff]  ;;  %1417 = vset.pattern.permute.xlu1 %v1505_v33  ;;  %1418 = vset.pattern.permute.xlu2 %v1505_v33  ;;  %s172_s29 = scalar_lea.vmem %s1792_s3, %s1278_s24 }
   0xf   : > { %1419 = vset.pattern.permute.xlu0 %v1505_v33 }
  0x10   : > { %225 = vmatpush.bf16.msra.mxu0 %v1386_v1 }
  0x11   : > { %283 = vmatpush.bf16.msra.mxu1 %v1388_v6 }
  0x14   : > { %226 = vmatpush.bf16.msra.mxu0 %v1385_v2 }
  0x18   : > { %227 = vmatpush.bf16.msra.mxu0 %v1384_v3 }
  0x1b   : > { %1299 = vmatmul.msk.bf16.vlgmr.msra.gmra.mxu0 %vm216_vm0, %v1383_v4 }
  0x98   : > { %v229_v7 = vpop.f32.mrf.mxu0 }
  0x99   : > { %v1562_v10 = vadd.f32 %v1420_v8, %v229_v7 }
  0xa0   : > { %v231_v9 = vpop.f32.mrf.mxu0 }
  0xa1   : > { %v1564_v11 = vadd.f32 %v1420_v8, %v231_v9 }
  0xa3   : > { %v258_v12 = vpack.c.bf16 %v1564_v11, %v1562_v10 }
  0xa5   : > { %1308 = vmatmul.msk.bf16.vlgmr.msra.gmra.mxu1 %vm272_vm1, %v258_v12 }
 0x122   : > { %v285_v13 = vpop.f32.mrf.mxu1 }
 0x123   : > { %v286_v15 = vadd.f32 %v1421_v14, %v285_v13 }
 0x125   : > { %v299_v18 = vsel %vm298_vm2, %v286_v15, -inf  ;;  %v290_v34 = vmul.f32 0.5, %v286_v15 }
 0x12a   : > { %v287_v16 = vpop.f32.mrf.mxu1 }
 0x12b   : > { %v288_v17 = vadd.f32 %v1421_v14, %v287_v16 }
 0x12d   : > { %v300_v19 = vsel %vm298_vm2, %v288_v17, -inf  ;;  %v291_v35 = vmul.f32 0.5, %v288_v17 }
 0x12e   : > { %v301_v20 = vmax.f32 %v299_v18, %v300_v19 }
 0x130   : > { %v302_v21 = vrot.slane %v301_v20, 4 }
 0x132   : > { %v303_v22 = vmax.f32 %v301_v20, %v302_v21 }
 0x134   : > { %v304_v23 = vrot.slane %v303_v22, 2 }
 0x136   : > { %v305_v24 = vmax.f32 %v303_v22, %v304_v23 }
 0x138   : > { %v306_v25 = vrot.slane %v305_v24, 1 }
 0x13a   : > { %v307_v26 = vmax.f32 %v305_v24, %v306_v25 }
 0x13c   : > { %v308_v27 = vsub.f32 %v286_v15, %v307_v26  ;;  %v309_v29 = vsub.f32 %v288_v17, %v307_v26 }
 0x13e   : > { %v310_v28 = vmul.f32 1.442695, %v308_v27  ;;  %v312_v30 = vmul.f32 1.442695, %v309_v29 }
 0x140   : > { %1438 = vpow2.f32 %v310_v28 }
 0x141   : > { %1440 = vpow2.f32 %v312_v30 }
 0x142   : > { %1442 = vtanh.f32 %v290_v34 }
 0x143   : > { %1444 = vtanh.f32 %v291_v35 }
 0x146   : > { %v1439_v31 = vpop.eup %1438 }
 0x147   : > { %316 = vrot.lane.b32.xlu0 %v1439_v31, %s1504_s8  ;;  %v1441_v32 = vpop.eup %1440 }
 0x148   : > { %v1443_v36 = vpop.eup %1442 }
 0x149   : > { %v294_v37 = vadd.f32 1.0, %v1443_v36  ;;  %v1445_v39 = vpop.eup %1444  ;;  %v1506_v36 = vmov 16.0  }
 0x14a   : > { %v295_v42 = vadd.f32 1.0, %v1445_v39 }
 0x14b   : > { %v296_v38 = vmul.f32 0.5, %v294_v37 }
 0x14c   : > { %v297_v43 = vmul.f32 0.5, %v295_v42 }
 0x14f   : > { %318 = vrot.lane.b32.xlu0 %v1441_v32, %s1504_s8 }
 0x1b9   : > { %v317_v40 = vpop.permute.xlu0 %316 }
 0x1ba   : > { %v322_v41 = vmul.f32 %v317_v40, %v296_v38 }
 0x1bc   : > { %351 = vperm.xlu1 %1417, %v322_v41   ;;  %v325_v46 = vsel %vm324_vm3, %v322_v41, 0.0 }
 0x1c1   : > { %v319_v44 = vpop.permute.xlu0 %318 }
 0x1c2   : > { %v323_v45 = vmul.f32 %v319_v44, %v297_v43 }
 0x1c4   : > { %v326_v47 = vsel %vm324_vm3, %v323_v45, 0.0  ;;  %356 = vperm.xlu1 %1417, %v323_v45  }
 0x1c5   : > { %v327_v48 = vadd.f32 %v326_v47, %v325_v46 }
 0x1c7   : > { %v328_v49 = vrot.slane %v327_v48, 4 }
 0x1c9   : > { %v329_v50 = vadd.f32 %v328_v49, %v327_v48 }
 0x1cb   : > { %v330_v51 = vrot.slane %v329_v50, 2 }
 0x1cd   : > { %v331_v52 = vadd.f32 %v330_v51, %v329_v50  ;;  %v1391_v51 = vld [vmem:[%s1790_s1 + $0x40] sm:$0xff] }
 0x1ce   : > { %480 = vmatpush.bf16.msra.mxu2 %v1391_v51 }
 0x1cf   : > { %v332_v53 = vrot.slane %v331_v52, 1 }
 0x1d1   : > { %v333_v54 = vadd.f32 %v332_v53, %v331_v52 }
 0x1d3   : > { %1446 = vrcp.f32 %v333_v54  ;;  %v345_v58 = vand.u32 2147483648, %v333_v54  ;;  %v343_v60 = vand.u32 2147483647, %v333_v54  ;;  %vm339_vm5 = vweird.f32 %v333_v54 }
 0x1d5   : > { %v346_v62 = vor.u32 1.1754944e-38, %v345_v58  ;;  %vm344_vm7 = vcmp.eq.f32.partialorder %v343_v60, 8.507059e+37 }
 0x1d9   : > { %v1447_v55 = vpop.eup %1446 }
 0x1da   : > { %v335_v56 = vmul.f32 %v1447_v55, %v333_v54  ;;  %vm340_vm4 = vweird.f32 %v1447_v55  ;;  %v1390_v54 = vld [vmem:[%s1790_s1 + $0x38] sm:$0xff] }
 0x1db   : > { %vm341_vm6 = vmor %vm339_vm5, %vm340_vm4  ;;  %481 = vmatpush.bf16.msra.mxu2 %v1390_v54 }
 0x1dc   : > { %v336_v57 = vsub.f32 1.0, %v335_v56 }
 0x1de   : > { %v337_v59 = vmul.f32 %v1447_v55, %v336_v57 }
 0x1e0   : > { %v338_v61 = vadd.f32 %v1447_v55, %v337_v59 }
 0x1e2   : > { %v342_v63 = vsel %vm341_vm6, %v1447_v55, %v338_v61 }
 0x1e3   : > { %v347_v0 = vsel %vm344_vm7, %v346_v62, %v342_v63 }
 0x1e4   : > { %372 = vperm.xlu2 %1418, %v347_v0  }
 0x22e   : > { %v352_v1 = vpop.permute.xlu1 %351 }
 0x22f   : > { %v359_v2 = vmul.f32 %v352_v1, %v1562_v10 }
 0x231   : > { %v361_v5 = vsel %vm272_vm1, %v359_v2, 0.0 }
 0x236   : > { %v357_v3 = vpop.permute.xlu1 %356 }
 0x237   : > { %v360_v4 = vmul.f32 %v357_v3, %v1564_v11 }
 0x239   : > { %v362_v6 = vsel %vm272_vm1, %v360_v4, 0.0 }
 0x23a   : > { %v363_v7 = vadd.f32 %v362_v6, %v361_v5 }
 0x23c   : > { %v364_v8 = vrot.slane %v363_v7, 4 }
 0x23e   : > { %v365_v9 = vadd.f32 %v364_v8, %v363_v7  ;;  %v373_v16 = vpop.permute.xlu2 %372 }
 0x240   : > { %v366_v12 = vrot.slane %v365_v9, 2 }
 0x242   : > { %v367_v13 = vadd.f32 %v366_v12, %v365_v9 }
 0x244   : > { %v368_v14 = vrot.slane %v367_v13, 1 }
 0x246   : > { %v369_v15 = vadd.f32 %v368_v14, %v367_v13 }
 0x248   : > { %v375_v17 = vmul.f32 %v373_v16, %v369_v15 }
 0x24a   : > { %v376_v18 = vsub.f32 %v1562_v10, %v375_v17  ;;  %v377_v19 = vsub.f32 %v1564_v11, %v375_v17 }
 0x24c   : > { %v378_v20 = vmul.f32 %v376_v18, %v352_v1  ;;  %v379_v21 = vmul.f32 %v377_v19, %v357_v3 }
 0x24e   : > { %v380_v22 = vmul.f32 %v378_v20, %v376_v18  ;;  %v381_v23 = vmul.f32 %v379_v21, %v377_v19 }
 0x250   : > { %v382_v24 = vsel %vm272_vm1, %v380_v22, 0.0  ;;  %v383_v25 = vsel %vm272_vm1, %v381_v23, 0.0  ;;  %v1422_v22 = vld [vmem:[%s1791_s2 + $0x5] ss:$0 sm:$0xff] }
 0x251   : > { %v384_v26 = vadd.f32 %v383_v25, %v382_v24 }
 0x253   : > { %v385_v27 = vrot.slane %v384_v26, 4 }
 0x255   : > { %v386_v28 = vadd.f32 %v385_v27, %v384_v26  ;;  %v1423_v26 = vld [vmem:[%s1791_s2 + $0x6] ss:$0 sm:$0xff] }
 0x257   : > { %v387_v29 = vrot.slane %v386_v28, 2 }
 0x259   : > { %v388_v30 = vadd.f32 %v387_v29, %v386_v28 }
 0x25b   : > { %v389_v31 = vrot.slane %v388_v30, 1 }
 0x25d   : > { %v390_v32 = vadd.f32 %v389_v31, %v388_v30 }
 0x25f   : > { %v391_v33 = vmul.f32 %v390_v32, %v373_v16 }
 0x261   : > { %v392_v34 = vadd.f32 1e-05, %v391_v33 }
 0x263   : > { %1448 = vrsqrt.f32 %v392_v34  ;;  %vm399_vm9 = vweird.f32 %v392_v34 }
 0x264   : > { %1450 = vrcp.f32 %v1506_v36 }
 0x269   : > { %v1449_v35 = vpop.eup %1448 }
 0x26a   : > { %v394_v37 = vmul.f32 %v1449_v35, %v392_v34  ;;  %v1451_v40 = vpop.eup %1450  ;;  %vm400_vm8 = vweird.f32 %v1449_v35  ;;  %v1393_v34 = vld [vmem:[%s1790_s1 + $0x50] sm:$0xff] }
 0x26b   : > { %v415_v43 = vmul.f32 16.0, %v1451_v40  ;;  %vm401_vm10 = vmor %vm399_vm9, %vm400_vm8  ;;  %vm419_vm11 = vweird.f32 %v1451_v40  ;;  %511 = vmatpush.bf16.msra.mxu3 %v1393_v34 }
 0x26c   : > { %v395_v38 = vmul.f32 %v1449_v35, %v394_v37  ;;  %v1424_v37 = vld [vmem:[%s1791_s2 + $0x7] ss:$0 sm:$0xff] }
 0x26d   : > { %v416_v47 = vsub.f32 1.0, %v415_v43  ;;  %v1425_v43 = vld [vmem:[%s1791_s2 + $0x8] ss:$0 sm:$0xff] }
 0x26e   : > { %v396_v39 = vmul.f32 0.5, %v395_v38 }
 0x26f   : > { %v417_v53 = vmul.f32 %v1451_v40, %v416_v47 }
 0x270   : > { %v397_v41 = vsub.f32 1.5, %v396_v39 }
 0x271   : > { %v418_v57 = vadd.f32 %v1451_v40, %v417_v53 }
 0x272   : > { %v398_v42 = vmul.f32 %v1449_v35, %v397_v41 }
 0x273   : > { %v1594_v60 = vsel %vm419_vm11, %v1451_v40, %v418_v57 }
 0x274   : > { %v402_v44 = vsel %vm401_vm10, %v1449_v35, %v398_v42  ;;  %v1392_v35 = vld [vmem:[%s1790_s1 + $0x48] sm:$0xff] }
 0x275   : > { %v403_v45 = vmul.f32 %v402_v44, %v376_v18  ;;  %v404_v46 = vmul.f32 %v402_v44, %v377_v19  ;;  %512 = vmatpush.bf16.msra.mxu3 %v1392_v35 }
 0x277   : > { %v405_v48 = vsel %vm272_vm1, %v403_v45, 0.0  ;;  %v406_v49 = vsel %vm272_vm1, %v404_v46, 0.0 }
 0x278   : > { %v407_v50 = vadd.f32 %v406_v49, %v405_v48 }
 0x27a   : > { %v408_v52 = vrot.slane %v407_v50, 4 }
 0x27c   : > { %v409_v55 = vadd.f32 %v408_v52, %v407_v50 }
 0x27e   : > { %v410_v56 = vrot.slane %v409_v55, 2 }
 0x280   : > { %v411_v58 = vadd.f32 %v410_v56, %v409_v55 }
 0x282   : > { %v412_v59 = vrot.slane %v411_v58, 1 }
 0x284   : > { %v413_v61 = vadd.f32 %v412_v59, %v411_v58 }
 0x286   : > { %v421_v62 = vmul.f32 %v1594_v60, %v413_v61 }
 0x288   : > { %v422_v63 = vsub.f32 %v403_v45, %v421_v62  ;;  %v423_v0 = vsub.f32 %v404_v46, %v421_v62 }
 0x28a   : > { %v424_v1 = vmul.f32 %v422_v63, %v422_v63  ;;  %v425_v2 = vmul.f32 %v423_v0, %v423_v0 }
 0x28c   : > { %v426_v3 = vsel %vm272_vm1, %v424_v1, 0.0  ;;  %v427_v4 = vsel %vm272_vm1, %v425_v2, 0.0 }
 0x28d   : > { %v428_v5 = vadd.f32 %v427_v4, %v426_v3 }
 0x28f   : > { %v429_v6 = vrot.slane %v428_v5, 4 }
 0x291   : > { %v430_v7 = vadd.f32 %v429_v6, %v428_v5 }
 0x293   : > { %v431_v8 = vrot.slane %v430_v7, 2 }
 0x295   : > { %v432_v9 = vadd.f32 %v431_v8, %v430_v7 }
 0x297   : > { %v433_v12 = vrot.slane %v432_v9, 1 }
 0x299   : > { %v434_v13 = vadd.f32 %v433_v12, %v432_v9 }
 0x29b   : > { %v435_v14 = vmul.f32 %v434_v13, %v1594_v60 }
 0x29d   : > { %v436_v15 = vadd.f32 1e-05, %v435_v14 }
 0x29f   : > { %1452 = vrsqrt.f32 %v436_v15  ;;  %vm443_vm13 = vweird.f32 %v436_v15 }
 0x2a5   : > { %v1453_v16 = vpop.eup %1452 }
 0x2a6   : > { %v438_v17 = vmul.f32 %v1453_v16, %v436_v15  ;;  %vm444_vm12 = vweird.f32 %v1453_v16 }
 0x2a7   : > { %vm445_vm14 = vmor %vm443_vm13, %vm444_vm12 }
 0x2a8   : > { %v439_v18 = vmul.f32 %v1453_v16, %v438_v17 }
 0x2aa   : > { %v440_v19 = vmul.f32 0.5, %v439_v18 }
 0x2ac   : > { %v441_v20 = vsub.f32 1.5, %v440_v19 }
 0x2ae   : > { %v442_v21 = vmul.f32 %v1453_v16, %v441_v20 }
 0x2b0   : > { %v446_v23 = vsel %vm445_vm14, %v1453_v16, %v442_v21 }
 0x2b1   : > { %v447_v24 = vmul.f32 %v446_v23, %v422_v63  ;;  %v448_v25 = vmul.f32 %v446_v23, %v423_v0 }
 0x2b3   : > { %v450_v27 = vmul.f32 %v1422_v22, %v447_v24  ;;  %v451_v28 = vmul.f32 %v1422_v22, %v448_v25 }
 0x2b5   : > { %v453_v29 = vadd.f32 %v1423_v26, %v450_v27  ;;  %v454_v30 = vadd.f32 %v1423_v26, %v451_v28 }
 0x2b7   : > { %v455_v31 = vmax.f32 %v453_v29, 0.0  ;;  %v456_v32 = vmax.f32 %v454_v30, 0.0 }
 0x2b9   : > { %v457_v33 = vpack.c.bf16 %v456_v32, %v455_v31 }
 0x2bb   : > { %1317 = vmatmul.msk.bf16.vlgmr.msra.gmra.mxu2 %vm272_vm1, %v457_v33 }
 0x33e   : > { %v483_v36 = vpop.f32.mrf.mxu2 }
 0x33f   : > { %v1616_v39 = vadd.f32 %v1424_v37, %v483_v36 }
 0x346   : > { %v485_v38 = vpop.f32.mrf.mxu2 }
 0x347   : > { %v1618_v40 = vadd.f32 %v1424_v37, %v485_v38 }
 0x349   : > { %v488_v41 = vpack.c.bf16 %v1618_v40, %v1616_v39 }
 0x34b   : > { %1326 = vmatmul.msk.bf16.vlgmr.msra.gmra.mxu3 %vm272_vm1, %v488_v41 }
 0x3ce   : > { %v514_v42 = vpop.f32.mrf.mxu3 }
 0x3cf   : > { %v515_v44 = vadd.f32 %v1425_v43, %v514_v42 }
 0x3d1   : > { %v527_v47 = vsel %vm298_vm2, %v515_v44, -inf  ;;  %v519_v63 = vmul.f32 0.5, %v515_v44 }
 0x3d6   : > { %v516_v45 = vpop.f32.mrf.mxu3 }
 0x3d7   : > { %v517_v46 = vadd.f32 %v1425_v43, %v516_v45 }
 0x3d9   : > { %v528_v48 = vsel %vm298_vm2, %v517_v46, -inf  ;;  %v520_v5 = vmul.f32 0.5, %v517_v46 }
 0x3da   : > { %v529_v49 = vmax.f32 %v527_v47, %v528_v48 }
 0x3dc   : > { %v530_v50 = vrot.slane %v529_v49, 4 }
 0x3de   : > { %v531_v51 = vmax.f32 %v529_v49, %v530_v50 }
 0x3e0   : > { %v532_v52 = vrot.slane %v531_v51, 2 }
 0x3e2   : > { %v533_v53 = vmax.f32 %v531_v51, %v532_v52 }
 0x3e4   : > { %v534_v54 = vrot.slane %v533_v53, 1 }
 0x3e6   : > { %v535_v55 = vmax.f32 %v533_v53, %v534_v54 }
 0x3e8   : > { %v536_v56 = vsub.f32 %v515_v44, %v535_v55  ;;  %v537_v57 = vsub.f32 %v517_v46, %v535_v55 }
 0x3ea   : > { %v538_v58 = vmul.f32 1.442695, %v536_v56  ;;  %v540_v59 = vmul.f32 1.442695, %v537_v57 }
 0x3ec   : > { %1454 = vpow2.f32 %v538_v58 }
 0x3ed   : > { %1456 = vpow2.f32 %v540_v59 }
 0x3ee   : > { %1458 = vtanh.f32 %v519_v63 }
 0x3ef   : > { %1460 = vtanh.f32 %v520_v5 }
 0x3f2   : > { %v1455_v61 = vpop.eup %1454 }
 0x3f3   : > { %v1457_v62 = vpop.eup %1456  ;;  %544 = vrot.lane.b32.xlu2 %v1455_v61, %s1504_s8 }
 0x3f4   : > { %546 = vrot.lane.b32.xlu0 %v1457_v62, %s1504_s8  ;;  %v1459_v0 = vpop.eup %1458 }
 0x3f5   : > { %v523_v1 = vadd.f32 1.0, %v1459_v0  ;;  %v1461_v6 = vpop.eup %1460 }
 0x3f6   : > { %v524_v7 = vadd.f32 1.0, %v1461_v6 }
 0x3f7   : > { %v525_v2 = vmul.f32 0.5, %v523_v1 }
 0x3f8   : > { %v526_v8 = vmul.f32 0.5, %v524_v7 }
 0x44d   : > { %v545_v3 = vpop.permute.xlu2 %544 }
 0x44e   : > { %v550_v4 = vmul.f32 %v545_v3, %v525_v2 }
 0x450   : > { %578 = vperm.xlu1 %1417, %v550_v4   ;;  %v552_v13 = vsel %vm324_vm3, %v550_v4, 0.0 }
 0x466   : > { %v547_v9 = vpop.permute.xlu0 %546 }
 0x467   : > { %v551_v12 = vmul.f32 %v547_v9, %v526_v8 }
 0x469   : > { %v553_v14 = vsel %vm324_vm3, %v551_v12, 0.0  ;;  %583 = vperm.xlu2 %1418, %v551_v12  }
 0x46a   : > { %v554_v15 = vadd.f32 %v553_v14, %v552_v13 }
 0x46c   : > { %v555_v16 = vrot.slane %v554_v15, 4 }
 0x46e   : > { %v556_v17 = vadd.f32 %v555_v16, %v554_v15 }
 0x470   : > { %v557_v18 = vrot.slane %v556_v17, 2 }
 0x472   : > { %v558_v19 = vadd.f32 %v557_v18, %v556_v17 }
 0x474   : > { %v559_v20 = vrot.slane %v558_v19, 1 }
 0x476   : > { %v560_v21 = vadd.f32 %v559_v20, %v558_v19 }
 0x478   : > { %1462 = vrcp.f32 %v560_v21  ;;  %v572_v25 = vand.u32 2147483648, %v560_v21  ;;  %v570_v27 = vand.u32 2147483647, %v560_v21  ;;  %vm566_vm0 = vweird.f32 %v560_v21 }
 0x47a   : > { %v573_v29 = vor.u32 1.1754944e-38, %v572_v25  ;;  %vm571_vm5 = vcmp.eq.f32.partialorder %v570_v27, 8.507059e+37 }
 0x47e   : > { %v1463_v22 = vpop.eup %1462 }
 0x47f   : > { %v562_v23 = vmul.f32 %v1463_v22, %v560_v21  ;;  %vm567_vm15 = vweird.f32 %v1463_v22 }
 0x480   : > { %vm568_vm4 = vmor %vm566_vm0, %vm567_vm15 }
 0x481   : > { %v563_v24 = vsub.f32 1.0, %v562_v23 }
 0x483   : > { %v564_v26 = vmul.f32 %v1463_v22, %v563_v24 }
 0x485   : > { %v565_v28 = vadd.f32 %v1463_v22, %v564_v26 }
 0x487   : > { %v569_v30 = vsel %vm568_vm4, %v1463_v22, %v565_v28 }
 0x488   : > { %v574_v31 = vsel %vm571_vm5, %v573_v29, %v569_v30 }
 0x489   : > { %599 = vperm.xlu0 %1419, %v574_v31   ;;  %v1395_v31 = vld [vmem:[%s1790_s1 + $0x60] sm:$0xff] }
 0x48a   : > { %700 = vmatpush.bf16.msrb.mxu1 %v1395_v31 }
 0x4c2   : > { %v579_v33 = vpop.permute.xlu1 %578 }
 0x4c3   : > { %v584_v32 = vpop.permute.xlu2 %583  ;;  %v586_v35 = vmul.f32 %v579_v33, %v1616_v39 }
 0x4c4   : > { %v587_v34 = vmul.f32 %v584_v32, %v1618_v40 }
 0x4c5   : > { %v588_v37 = vsel %vm272_vm1, %v586_v35, 0.0 }
 0x4c6   : > { %v589_v36 = vsel %vm272_vm1, %v587_v34, 0.0 }
 0x4c7   : > { %v590_v38 = vadd.f32 %v589_v36, %v588_v37 }
 0x4c9   : > { %v591_v41 = vrot.slane %v590_v38, 4 }
 0x4cb   : > { %v592_v42 = vadd.f32 %v591_v41, %v590_v38  ;;  %v1397_v38 = vld [vmem:[%s1790_s1 + $0x70] sm:$0xff] }
 0x4cc   : > { %757 = vmatpush.bf16.msrb.mxu2 %v1397_v38 }
 0x4cd   : > { %v593_v43 = vrot.slane %v592_v42, 2 }
 0x4cf   : > { %v594_v44 = vadd.f32 %v593_v43, %v592_v42 }
 0x4d1   : > { %v595_v45 = vrot.slane %v594_v44, 1 }
 0x4d3   : > { %v596_v46 = vadd.f32 %v595_v45, %v594_v44 }
 0x4fb   : > { %v600_v47 = vpop.permute.xlu0 %599 }
 0x4fc   : > { %v602_v48 = vmul.f32 %v600_v47, %v596_v46 }
 0x4fe   : > { %v603_v49 = vsub.f32 %v1616_v39, %v602_v48  ;;  %v604_v50 = vsub.f32 %v1618_v40, %v602_v48  ;;  %v1426_v48 = vld [vmem:[%s1791_s2 + $0x9] ss:$0 sm:$0xff] }
 0x500   : > { %v605_v51 = vmul.f32 %v603_v49, %v579_v33  ;;  %v606_v52 = vmul.f32 %v604_v50, %v584_v32  ;;  %v1394_v33 = vld [vmem:[%s1790_s1 + $0x58] sm:$0xff] }
 0x501   : > { %701 = vmatpush.bf16.msrb.mxu1 %v1394_v33 }
 0x502   : > { %v607_v53 = vmul.f32 %v605_v51, %v603_v49  ;;  %v608_v54 = vmul.f32 %v606_v52, %v604_v50  ;;  %v1427_v52 = vld [vmem:[%s1791_s2 + $0xa] ss:$0 sm:$0xff] }
 0x504   : > { %v609_v55 = vsel %vm272_vm1, %v607_v53, 0.0  ;;  %v610_v56 = vsel %vm272_vm1, %v608_v54, 0.0 }
 0x505   : > { %v611_v57 = vadd.f32 %v610_v56, %v609_v55 }
 0x507   : > { %v612_v58 = vrot.slane %v611_v57, 4 }
 0x509   : > { %v613_v59 = vadd.f32 %v612_v58, %v611_v57 }
 0x50b   : > { %v614_v61 = vrot.slane %v613_v59, 2 }
 0x50d   : > { %v615_v62 = vadd.f32 %v614_v61, %v613_v59  ;;  %v1396_v61 = vld [vmem:[%s1790_s1 + $0x68] sm:$0xff] }
 0x50e   : > { %758 = vmatpush.bf16.msrb.mxu2 %v1396_v61 }
 0x50f   : > { %v616_v63 = vrot.slane %v615_v62, 1 }
 0x511   : > { %v617_v0 = vadd.f32 %v616_v63, %v615_v62  ;;  %v1428_v63 = vld [vmem:[%s1791_s2 + $0xb] ss:$0 sm:$0xff] }
 0x513   : > { %v618_v1 = vmul.f32 %v617_v0, %v600_v47 }
 0x515   : > { %v619_v2 = vadd.f32 1e-05, %v618_v1 }
 0x517   : > { %1464 = vrsqrt.f32 %v619_v2  ;;  %vm626_vm7 = vweird.f32 %v619_v2 }
 0x51d   : > { %v1465_v39 = vpop.eup %1464 }
 0x51e   : > { %v621_v40 = vmul.f32 %v1465_v39, %v619_v2  ;;  %vm627_vm6 = vweird.f32 %v1465_v39 }
 0x51f   : > { %vm628_vm8 = vmor %vm626_vm7, %vm627_vm6 }
 0x520   : > { %v622_v3 = vmul.f32 %v1465_v39, %v621_v40 }
 0x522   : > { %v623_v4 = vmul.f32 0.5, %v622_v3 }
 0x524   : > { %v624_v5 = vsub.f32 1.5, %v623_v4 }
 0x526   : > { %v625_v6 = vmul.f32 %v1465_v39, %v624_v5  ;;  %v1429_v5 = vld [vmem:[%s1791_s2 + $0xc] ss:$0 sm:$0xff] }
 0x528   : > { %v629_v7 = vsel %vm628_vm8, %v1465_v39, %v625_v6 }
 0x529   : > { %v630_v8 = vmul.f32 %v629_v7, %v603_v49  ;;  %v631_v9 = vmul.f32 %v629_v7, %v604_v50 }
 0x52b   : > { %v632_v12 = vsel %vm272_vm1, %v630_v8, 0.0  ;;  %v633_v13 = vsel %vm272_vm1, %v631_v9, 0.0 }
 0x52c   : > { %v634_v14 = vadd.f32 %v633_v13, %v632_v12 }
 0x52e   : > { %v635_v15 = vrot.slane %v634_v14, 4 }
 0x530   : > { %v636_v16 = vadd.f32 %v635_v15, %v634_v14 }
 0x532   : > { %v637_v17 = vrot.slane %v636_v16, 2 }
 0x534   : > { %v638_v18 = vadd.f32 %v637_v17, %v636_v16 }
 0x536   : > { %v639_v19 = vrot.slane %v638_v18, 1 }
 0x538   : > { %v640_v20 = vadd.f32 %v639_v19, %v638_v18 }
 0x53a   : > { %v641_v21 = vmul.f32 %v640_v20, %v1594_v60 }
 0x53c   : > { %v642_v22 = vsub.f32 %v630_v8, %v641_v21  ;;  %v643_v23 = vsub.f32 %v631_v9, %v641_v21 }
 0x53e   : > { %v644_v24 = vmul.f32 %v642_v22, %v642_v22  ;;  %v645_v25 = vmul.f32 %v643_v23, %v643_v23 }
 0x540   : > { %v646_v26 = vsel %vm272_vm1, %v644_v24, 0.0  ;;  %v647_v27 = vsel %vm272_vm1, %v645_v25, 0.0 }
 0x541   : > { %v648_v28 = vadd.f32 %v647_v27, %v646_v26 }
 0x543   : > { %v649_v29 = vrot.slane %v648_v28, 4 }
 0x545   : > { %v650_v30 = vadd.f32 %v649_v29, %v648_v28 }
 0x547   : > { %v651_v32 = vrot.slane %v650_v30, 2 }
 0x549   : > { %v652_v34 = vadd.f32 %v651_v32, %v650_v30 }
 0x54b   : > { %v653_v35 = vrot.slane %v652_v34, 1 }
 0x54d   : > { %v654_v36 = vadd.f32 %v653_v35, %v652_v34 }
 0x54f   : > { %v655_v37 = vmul.f32 %v654_v36, %v1594_v60 }
 0x551   : > { %v656_v41 = vadd.f32 1e-05, %v655_v37 }
 0x553   : > { %1466 = vrsqrt.f32 %v656_v41  ;;  %vm663_vm10 = vweird.f32 %v656_v41 }
 0x559   : > { %v1467_v42 = vpop.eup %1466 }
 0x55a   : > { %v658_v43 = vmul.f32 %v1467_v42, %v656_v41  ;;  %vm664_vm9 = vweird.f32 %v1467_v42 }
 0x55b   : > { %vm665_vm11 = vmor %vm663_vm10, %vm664_vm9 }
 0x55c   : > { %v659_v44 = vmul.f32 %v1467_v42, %v658_v43 }
 0x55e   : > { %v660_v45 = vmul.f32 0.5, %v659_v44 }
 0x560   : > { %v661_v46 = vsub.f32 1.5, %v660_v45 }
 0x562   : > { %v662_v47 = vmul.f32 %v1467_v42, %v661_v46 }
 0x564   : > { %v666_v49 = vsel %vm665_vm11, %v1467_v42, %v662_v47 }
 0x565   : > { %v667_v50 = vmul.f32 %v666_v49, %v642_v22  ;;  %v668_v51 = vmul.f32 %v666_v49, %v643_v23 }
 0x567   : > { %v670_v53 = vmul.f32 %v1426_v48, %v667_v50  ;;  %v671_v54 = vmul.f32 %v1426_v48, %v668_v51 }
 0x569   : > { %v673_v55 = vadd.f32 %v1427_v52, %v670_v53  ;;  %v674_v56 = vadd.f32 %v1427_v52, %v671_v54 }
 0x56b   : > { %v675_v57 = vmax.f32 %v673_v55, 0.0  ;;  %v676_v58 = vmax.f32 %v674_v56, 0.0 }
 0x56d   : > { %v677_v59 = vpack.c.bf16 %v676_v58, %v675_v57 }
 0x56f   : > { %1335 = vmatmul.msk.bf16.vlgmr.msrb.gmra.mxu1 %vm272_vm1, %v677_v59 }
 0x5ec   : > { %v703_v62 = vpop.f32.mrf.mxu1 }
 0x5ed   : > { %v704_v0 = vadd.f32 %v1428_v63, %v703_v62 }
 0x5ef   : > { %v1669_v39 = vadd.f32 %v704_v0, %v1562_v10 }
 0x5f4   : > { %v705_v1 = vpop.f32.mrf.mxu1 }
 0x5f5   : > { %v706_v2 = vadd.f32 %v1428_v63, %v705_v1 }
 0x5f7   : > { %v1672_v40 = vadd.f32 %v706_v2, %v1564_v11 }
 0x5f9   : > { %v734_v3 = vpack.c.bf16 %v1672_v40, %v1669_v39 }
 0x5fb   : > { %1344 = vmatmul.msk.bf16.vlgmr.msrb.gmra.mxu2 %vm272_vm1, %v734_v3 }
 0x67e   : > { %v760_v4 = vpop.f32.mrf.mxu2 }
 0x67f   : > { %v761_v6 = vadd.f32 %v1429_v5, %v760_v4 }
 0x681   : > { %v773_v9 = vsel %vm298_vm2, %v761_v6, -inf  ;;  %v765_v30 = vmul.f32 0.5, %v761_v6 }
 0x686   : > { %v762_v7 = vpop.f32.mrf.mxu2 }
 0x687   : > { %v763_v8 = vadd.f32 %v1429_v5, %v762_v7 }
 0x689   : > { %v774_v10 = vsel %vm298_vm2, %v763_v8, -inf  ;;  %v766_v24 = vmul.f32 0.5, %v763_v8 }
 0x68a   : > { %v775_v12 = vmax.f32 %v773_v9, %v774_v10 }
 0x68c   : > { %v776_v11 = vrot.slane %v775_v12, 4 }
 0x68e   : > { %v777_v13 = vmax.f32 %v775_v12, %v776_v11 }
 0x690   : > { %v778_v14 = vrot.slane %v777_v13, 2 }
 0x692   : > { %v779_v15 = vmax.f32 %v777_v13, %v778_v14 }
 0x694   : > { %v780_v16 = vrot.slane %v779_v15, 1 }
 0x696   : > { %v781_v17 = vmax.f32 %v779_v15, %v780_v16 }
 0x698   : > { %v782_v18 = vsub.f32 %v761_v6, %v781_v17  ;;  %v783_v19 = vsub.f32 %v763_v8, %v781_v17 }
 0x69a   : > { %v784_v20 = vmul.f32 1.442695, %v782_v18  ;;  %v786_v21 = vmul.f32 1.442695, %v783_v19 }
 0x69c   : > { %1468 = vpow2.f32 %v784_v20 }
 0x69d   : > { %1470 = vpow2.f32 %v786_v21 }
 0x69e   : > { %1472 = vtanh.f32 %v766_v24 }
 0x69f   : > { %1474 = vtanh.f32 %v765_v30 }
 0x6a2   : > { %v1469_v22 = vpop.eup %1468 }
 0x6a3   : > { %v1471_v23 = vpop.eup %1470  ;;  %790 = vrot.lane.b32.xlu1 %v1469_v22, %s1504_s8 }
 0x6a4   : > { %792 = vrot.lane.b32.xlu2 %v1471_v23, %s1504_s8  ;;  %v1473_v25 = vpop.eup %1472 }
 0x6a5   : > { %v770_v26 = vadd.f32 1.0, %v1473_v25  ;;  %v1475_v31 = vpop.eup %1474 }
 0x6a6   : > { %v769_v32 = vadd.f32 1.0, %v1475_v31 }
 0x6a7   : > { %v772_v27 = vmul.f32 0.5, %v770_v26 }
 0x6a8   : > { %v771_v33 = vmul.f32 0.5, %v769_v32 }
 0x6fe   : > { %v793_v28 = vpop.permute.xlu2 %792 }
 0x6ff   : > { %v797_v29 = vmul.f32 %v793_v28, %v772_v27 }
 0x701   : > { %829 = vperm.xlu2 %1418, %v797_v29   ;;  %v799_v36 = vsel %vm324_vm3, %v797_v29, 0.0 }
 0x715   : > { %v791_v34 = vpop.permute.xlu1 %790 }
 0x716   : > { %v796_v35 = vmul.f32 %v791_v34, %v771_v33 }
 0x718   : > { %v798_v37 = vsel %vm324_vm3, %v796_v35, 0.0  ;;  %824 = vperm.xlu1 %1417, %v796_v35  }
 0x719   : > { %v800_v38 = vadd.f32 %v799_v36, %v798_v37 }
 0x71b   : > { %v801_v41 = vrot.slane %v800_v38, 4 }
 0x71d   : > { %v802_v42 = vadd.f32 %v801_v41, %v800_v38 }
 0x71f   : > { %v803_v43 = vrot.slane %v802_v42, 2 }
 0x721   : > { %v804_v44 = vadd.f32 %v803_v43, %v802_v42 }
 0x723   : > { %v805_v45 = vrot.slane %v804_v44, 1 }
 0x725   : > { %v806_v46 = vadd.f32 %v805_v45, %v804_v44 }
 0x727   : > { %1476 = vrcp.f32 %v806_v46  ;;  %v818_v50 = vand.u32 2147483648, %v806_v46  ;;  %v816_v52 = vand.u32 2147483647, %v806_v46  ;;  %vm812_vm13 = vweird.f32 %v806_v46 }
 0x729   : > { %v819_v54 = vor.u32 1.1754944e-38, %v818_v50  ;;  %vm817_vm15 = vcmp.eq.f32.partialorder %v816_v52, 8.507059e+37 }
 0x72d   : > { %v1477_v47 = vpop.eup %1476 }
 0x72e   : > { %v808_v48 = vmul.f32 %v1477_v47, %v806_v46  ;;  %vm813_vm12 = vweird.f32 %v1477_v47 }
 0x72f   : > { %vm814_vm14 = vmor %vm812_vm13, %vm813_vm12 }
 0x730   : > { %v809_v49 = vsub.f32 1.0, %v808_v48 }
 0x732   : > { %v810_v51 = vmul.f32 %v1477_v47, %v809_v49 }
 0x734   : > { %v811_v53 = vadd.f32 %v1477_v47, %v810_v51 }
 0x736   : > { %v815_v55 = vsel %vm814_vm14, %v1477_v47, %v811_v53 }
 0x737   : > { %v820_v56 = vsel %vm817_vm15, %v819_v54, %v815_v55 }
 0x738   : > { %845 = vperm.xlu0 %1419, %v820_v56   ;;  %v1399_v56 = vld [vmem:[%s1790_s1 + $0x80] sm:$0xff] }
 0x739   : > { %946 = vmatpush.bf16.msrb.mxu3 %v1399_v56 }
 0x75b   : > { %v830_v57 = vpop.permute.xlu2 %829 }
 0x75c   : > { %v833_v61 = vmul.f32 %v830_v57, %v1672_v40 }
 0x75e   : > { %v835_v63 = vsel %vm272_vm1, %v833_v61, 0.0 }
 0x78a   : > { %v825_v58 = vpop.permute.xlu1 %824 }
 0x78b   : > { %v832_v59 = vmul.f32 %v825_v58, %v1669_v39 }
 0x78d   : > { %v834_v62 = vsel %vm272_vm1, %v832_v59, 0.0 }
 0x78e   : > { %v836_v0 = vadd.f32 %v835_v63, %v834_v62 }
 0x790   : > { %v837_v1 = vrot.slane %v836_v0, 4 }
 0x792   : > { %v838_v2 = vadd.f32 %v837_v1, %v836_v0  ;;  %v1401_v0 = vld [vmem:[%s1790_s1 + $0x90] sm:$0xff] }
 0x793   : > { %977 = vmatpush.bf16.msrb.mxu0 %v1401_v0 }
 0x794   : > { %v839_v3 = vrot.slane %v838_v2, 2 }
 0x796   : > { %v840_v4 = vadd.f32 %v839_v3, %v838_v2 }
 0x798   : > { %v841_v5 = vrot.slane %v840_v4, 1 }
 0x79a   : > { %v842_v6 = vadd.f32 %v841_v5, %v840_v4 }
 0x7aa   : > { %v846_v7 = vpop.permute.xlu0 %845 }
 0x7ab   : > { %v848_v8 = vmul.f32 %v846_v7, %v842_v6 }
 0x7ad   : > { %v849_v9 = vsub.f32 %v1669_v39, %v848_v8  ;;  %v850_v10 = vsub.f32 %v1672_v40, %v848_v8  ;;  %v1430_v8 = vld [vmem:[%s1791_s2 + $0xd] ss:$0 sm:$0xff] }
 0x7af   : > { %v851_v12 = vmul.f32 %v849_v9, %v825_v58  ;;  %v852_v11 = vmul.f32 %v850_v10, %v830_v57  ;;  %v1398_v58 = vld [vmem:[%s1790_s1 + $0x78] sm:$0xff] }
 0x7b0   : > { %947 = vmatpush.bf16.msrb.mxu3 %v1398_v58 }
 0x7b1   : > { %v853_v13 = vmul.f32 %v851_v12, %v849_v9  ;;  %v854_v14 = vmul.f32 %v852_v11, %v850_v10  ;;  %v1431_v11 = vld [vmem:[%s1791_s2 + $0xe] ss:$0 sm:$0xff] }
 0x7b3   : > { %v855_v15 = vsel %vm272_vm1, %v853_v13, 0.0  ;;  %v856_v16 = vsel %vm272_vm1, %v854_v14, 0.0 }
 0x7b4   : > { %v857_v17 = vadd.f32 %v856_v16, %v855_v15 }
 0x7b6   : > { %v858_v18 = vrot.slane %v857_v17, 4 }
 0x7b8   : > { %v859_v19 = vadd.f32 %v858_v18, %v857_v17 }
 0x7ba   : > { %v860_v20 = vrot.slane %v859_v19, 2 }
 0x7bc   : > { %v861_v21 = vadd.f32 %v860_v20, %v859_v19  ;;  %v1400_v20 = vld [vmem:[%s1790_s1 + $0x88] sm:$0xff] }
 0x7bd   : > { %978 = vmatpush.bf16.msrb.mxu0 %v1400_v20 }
 0x7be   : > { %v862_v22 = vrot.slane %v861_v21, 1 }
 0x7c0   : > { %v863_v23 = vadd.f32 %v862_v22, %v861_v21  ;;  %v1432_v22 = vld [vmem:[%s1791_s2 + $0xf] ss:$0 sm:$0xff] }
 0x7c2   : > { %v864_v24 = vmul.f32 %v863_v23, %v846_v7 }
 0x7c4   : > { %v865_v25 = vadd.f32 1e-05, %v864_v24 }
 0x7c6   : > { %1478 = vrsqrt.f32 %v865_v25  ;;  %vm872_vm4 = vweird.f32 %v865_v25 }
 0x7cc   : > { %v1479_v26 = vpop.eup %1478 }
 0x7cd   : > { %v867_v27 = vmul.f32 %v1479_v26, %v865_v25  ;;  %vm873_vm0 = vweird.f32 %v1479_v26 }
 0x7ce   : > { %vm874_vm5 = vmor %vm872_vm4, %vm873_vm0 }
 0x7cf   : > { %v868_v28 = vmul.f32 %v1479_v26, %v867_v27 }
 0x7d1   : > { %v869_v29 = vmul.f32 0.5, %v868_v28  ;;  %v1433_v28 = vld [vmem:[%s1791_s2 + $0x10] ss:$0 sm:$0xff] }
 0x7d3   : > { %v870_v30 = vsub.f32 1.5, %v869_v29 }
 0x7d5   : > { %v871_v31 = vmul.f32 %v1479_v26, %v870_v30 }
 0x7d7   : > { %v875_v32 = vsel %vm874_vm5, %v1479_v26, %v871_v31 }
 0x7d8   : > { %v876_v33 = vmul.f32 %v875_v32, %v849_v9  ;;  %v877_v34 = vmul.f32 %v875_v32, %v850_v10 }
 0x7da   : > { %v878_v35 = vsel %vm272_vm1, %v876_v33, 0.0  ;;  %v879_v36 = vsel %vm272_vm1, %v877_v34, 0.0 }
 0x7db   : > { %v880_v37 = vadd.f32 %v879_v36, %v878_v35 }
 0x7dd   : > { %v881_v38 = vrot.slane %v880_v37, 4 }
 0x7df   : > { %v882_v41 = vadd.f32 %v881_v38, %v880_v37 }
 0x7e1   : > { %v883_v42 = vrot.slane %v882_v41, 2 }
 0x7e3   : > { %v884_v43 = vadd.f32 %v883_v42, %v882_v41 }
 0x7e5   : > { %v885_v44 = vrot.slane %v884_v43, 1 }
 0x7e7   : > { %v886_v45 = vadd.f32 %v885_v44, %v884_v43 }
 0x7e9   : > { %v887_v46 = vmul.f32 %v886_v45, %v1594_v60 }
 0x7eb   : > { %v888_v47 = vsub.f32 %v876_v33, %v887_v46  ;;  %v889_v48 = vsub.f32 %v877_v34, %v887_v46 }
 0x7ed   : > { %v890_v49 = vmul.f32 %v888_v47, %v888_v47  ;;  %v891_v50 = vmul.f32 %v889_v48, %v889_v48 }
 0x7ef   : > { %v892_v51 = vsel %vm272_vm1, %v890_v49, 0.0  ;;  %v893_v52 = vsel %vm272_vm1, %v891_v50, 0.0 }
 0x7f0   : > { %v894_v53 = vadd.f32 %v893_v52, %v892_v51 }
 0x7f2   : > { %v895_v54 = vrot.slane %v894_v53, 4 }
 0x7f4   : > { %v896_v55 = vadd.f32 %v895_v54, %v894_v53 }
 0x7f6   : > { %v897_v57 = vrot.slane %v896_v55, 2 }
 0x7f8   : > { %v898_v59 = vadd.f32 %v897_v57, %v896_v55 }
 0x7fa   : > { %v899_v61 = vrot.slane %v898_v59, 1 }
 0x7fc   : > { %v900_v62 = vadd.f32 %v899_v61, %v898_v59 }
 0x7fe   : > { %v901_v63 = vmul.f32 %v900_v62, %v1594_v60 }
 0x800   : > { %v902_v1 = vadd.f32 1e-05, %v901_v63 }
 0x802   : > { %1480 = vrsqrt.f32 %v902_v1  ;;  %vm909_vm7 = vweird.f32 %v902_v1 }
 0x808   : > { %v1481_v2 = vpop.eup %1480 }
 0x809   : > { %v904_v3 = vmul.f32 %v1481_v2, %v902_v1  ;;  %vm910_vm6 = vweird.f32 %v1481_v2 }
 0x80a   : > { %vm911_vm8 = vmor %vm909_vm7, %vm910_vm6 }
 0x80b   : > { %v905_v4 = vmul.f32 %v1481_v2, %v904_v3 }
 0x80d   : > { %v906_v5 = vmul.f32 0.5, %v905_v4 }
 0x80f   : > { %v907_v6 = vsub.f32 1.5, %v906_v5 }
 0x811   : > { %v908_v7 = vmul.f32 %v1481_v2, %v907_v6 }
 0x813   : > { %v912_v9 = vsel %vm911_vm8, %v1481_v2, %v908_v7 }
 0x814   : > { %v913_v10 = vmul.f32 %v912_v9, %v888_v47  ;;  %v914_v12 = vmul.f32 %v912_v9, %v889_v48 }
 0x816   : > { %v916_v13 = vmul.f32 %v1430_v8, %v913_v10  ;;  %v917_v14 = vmul.f32 %v1430_v8, %v914_v12 }
 0x818   : > { %v919_v15 = vadd.f32 %v1431_v11, %v916_v13  ;;  %v920_v16 = vadd.f32 %v1431_v11, %v917_v14 }
 0x81a   : > { %v921_v17 = vmax.f32 %v919_v15, 0.0  ;;  %v922_v18 = vmax.f32 %v920_v16, 0.0 }
 0x81c   : > { %v923_v19 = vpack.c.bf16 %v922_v18, %v921_v17 }
 0x81e   : > { %1353 = vmatmul.msk.bf16.vlgmr.msrb.gmra.mxu3 %vm272_vm1, %v923_v19 }
 0x8a1   : > { %v949_v21 = vpop.f32.mrf.mxu3 }
 0x8a2   : > { %v1722_v24 = vadd.f32 %v1432_v22, %v949_v21 }
 0x8a9   : > { %v951_v23 = vpop.f32.mrf.mxu3 }
 0x8aa   : > { %v1724_v25 = vadd.f32 %v1432_v22, %v951_v23 }
 0x8ac   : > { %v954_v26 = vpack.c.bf16 %v1724_v25, %v1722_v24 }
 0x8ae   : > { %1362 = vmatmul.msk.bf16.vlgmr.msrb.gmra.mxu0 %vm272_vm1, %v954_v26 }
 0x92b   : > { %v980_v27 = vpop.f32.mrf.mxu0 }
 0x92c   : > { %v981_v29 = vadd.f32 %v1433_v28, %v980_v27 }
 0x92e   : > { %v993_v32 = vsel %vm298_vm2, %v981_v29, -inf  ;;  %v985_v55 = vmul.f32 0.5, %v981_v29 }
 0x933   : > { %v982_v30 = vpop.f32.mrf.mxu0 }
 0x934   : > { %v983_v31 = vadd.f32 %v1433_v28, %v982_v30 }
 0x936   : > { %v994_v33 = vsel %vm298_vm2, %v983_v31, -inf  ;;  %v986_v49 = vmul.f32 0.5, %v983_v31 }
 0x937   : > { %v995_v34 = vmax.f32 %v993_v32, %v994_v33 }
 0x939   : > { %v996_v35 = vrot.slane %v995_v34, 4 }
 0x93b   : > { %v997_v36 = vmax.f32 %v995_v34, %v996_v35 }
 0x93d   : > { %v998_v37 = vrot.slane %v997_v36, 2 }
 0x93f   : > { %v999_v38 = vmax.f32 %v997_v36, %v998_v37 }
 0x941   : > { %v1000_v41 = vrot.slane %v999_v38, 1 }
 0x943   : > { %v1001_v42 = vmax.f32 %v999_v38, %v1000_v41 }
 0x945   : > { %v1002_v43 = vsub.f32 %v981_v29, %v1001_v42  ;;  %v1003_v44 = vsub.f32 %v983_v31, %v1001_v42 }
 0x947   : > { %v1004_v45 = vmul.f32 1.442695, %v1002_v43  ;;  %v1006_v46 = vmul.f32 1.442695, %v1003_v44 }
 0x949   : > { %1482 = vpow2.f32 %v1004_v45 }
 0x94a   : > { %1484 = vpow2.f32 %v1006_v46 }
 0x94b   : > { %1486 = vtanh.f32 %v986_v49 }
 0x94c   : > { %1488 = vtanh.f32 %v985_v55 }
 0x94f   : > { %v1483_v47 = vpop.eup %1482 }
 0x950   : > { %v1485_v48 = vpop.eup %1484  ;;  %1010 = vrot.lane.b32.xlu1 %v1483_v47, %s1504_s8 }
 0x951   : > { %1012 = vrot.lane.b32.xlu2 %v1485_v48, %s1504_s8  ;;  %v1487_v50 = vpop.eup %1486 }
 0x952   : > { %v990_v51 = vadd.f32 1.0, %v1487_v50  ;;  %v1489_v56 = vpop.eup %1488 }
 0x953   : > { %v989_v57 = vadd.f32 1.0, %v1489_v56 }
 0x954   : > { %v992_v52 = vmul.f32 0.5, %v990_v51 }
 0x955   : > { %v991_v58 = vmul.f32 0.5, %v989_v57 }
 0x9ab   : > { %v1013_v53 = vpop.permute.xlu2 %1012 }
 0x9ac   : > { %v1017_v54 = vmul.f32 %v1013_v53, %v992_v52 }
 0x9ae   : > { %1049 = vperm.xlu1 %1417, %v1017_v54   ;;  %v1019_v62 = vsel %vm324_vm3, %v1017_v54, 0.0 }
 0x9c2   : > { %v1011_v59 = vpop.permute.xlu1 %1010 }
 0x9c3   : > { %v1016_v61 = vmul.f32 %v1011_v59, %v991_v58 }
 0x9c5   : > { %v1018_v63 = vsel %vm324_vm3, %v1016_v61, 0.0  ;;  %1044 = vperm.xlu0 %1419, %v1016_v61  }
 0x9c6   : > { %v1020_v0 = vadd.f32 %v1019_v62, %v1018_v63 }
 0x9c8   : > { %v1021_v1 = vrot.slane %v1020_v0, 4 }
 0x9ca   : > { %v1022_v2 = vadd.f32 %v1021_v1, %v1020_v0 }
 0x9cc   : > { %v1023_v3 = vrot.slane %v1022_v2, 2 }
 0x9ce   : > { %v1024_v4 = vadd.f32 %v1023_v3, %v1022_v2 }
 0x9d0   : > { %v1025_v5 = vrot.slane %v1024_v4, 1 }
 0x9d2   : > { %v1026_v6 = vadd.f32 %v1025_v5, %v1024_v4 }
 0x9d4   : > { %1490 = vrcp.f32 %v1026_v6  ;;  %v1038_v10 = vand.u32 2147483648, %v1026_v6  ;;  %v1036_v11 = vand.u32 2147483647, %v1026_v6  ;;  %vm1032_vm9 = vweird.f32 %v1026_v6 }
 0x9d6   : > { %v1039_v14 = vor.u32 1.1754944e-38, %v1038_v10  ;;  %vm1037_vm11 = vcmp.eq.f32.partialorder %v1036_v11, 8.507059e+37 }
 0x9da   : > { %v1491_v7 = vpop.eup %1490 }
 0x9db   : > { %v1028_v8 = vmul.f32 %v1491_v7, %v1026_v6  ;;  %vm1033_vm2 = vweird.f32 %v1491_v7 }
 0x9dc   : > { %vm1034_vm10 = vmor %vm1032_vm9, %vm1033_vm2 }
 0x9dd   : > { %v1029_v9 = vsub.f32 1.0, %v1028_v8 }
 0x9df   : > { %v1030_v12 = vmul.f32 %v1491_v7, %v1029_v9 }
 0x9e1   : > { %v1031_v13 = vadd.f32 %v1491_v7, %v1030_v12 }
 0x9e3   : > { %v1035_v15 = vsel %vm1034_vm10, %v1491_v7, %v1031_v13 }
 0x9e4   : > { %v1040_v16 = vsel %vm1037_vm11, %v1039_v14, %v1035_v15 }
 0x9e5   : > { %1065 = vperm.xlu2 %1418, %v1040_v16  }
 0xa20   : > { %v1050_v17 = vpop.permute.xlu1 %1049 }
 0xa21   : > { %v1053_v18 = vmul.f32 %v1050_v17, %v1724_v25 }
 0xa23   : > { %v1055_v21 = vsel %vm272_vm1, %v1053_v18, 0.0 }
 0xa37   : > { %v1045_v19 = vpop.permute.xlu0 %1044 }
 0xa38   : > { %v1052_v20 = vmul.f32 %v1045_v19, %v1722_v24 }
 0xa3a   : > { %v1054_v22 = vsel %vm272_vm1, %v1052_v20, 0.0 }
 0xa3b   : > { %v1056_v23 = vadd.f32 %v1055_v21, %v1054_v22 }
 0xa3d   : > { %v1057_v26 = vrot.slane %v1056_v23, 4 }
 0xa3f   : > { %v1058_v27 = vadd.f32 %v1057_v26, %v1056_v23  ;;  %v1066_v32 = vpop.permute.xlu2 %1065  ;;  %v1405_v23 = vld [vmem:[%s1790_s1 + $0xb0] sm:$0xff] }
 0xa40   : > { %1204 = vmatpush.bf16.msra.mxu2 %v1405_v23 }
 0xa41   : > { %v1059_v28 = vrot.slane %v1058_v27, 2 }
 0xa43   : > { %v1060_v29 = vadd.f32 %v1059_v28, %v1058_v27 }
 0xa45   : > { %v1061_v30 = vrot.slane %v1060_v29, 1 }
 0xa47   : > { %v1062_v31 = vadd.f32 %v1061_v30, %v1060_v29 }
 0xa49   : > { %v1068_v33 = vmul.f32 %v1066_v32, %v1062_v31 }
 0xa4b   : > { %v1069_v34 = vsub.f32 %v1722_v24, %v1068_v33  ;;  %v1070_v35 = vsub.f32 %v1724_v25, %v1068_v33  ;;  %v1434_v33 = vld [vmem:[%s1791_s2 + $0x11] ss:$0 sm:$0xff] }
 0xa4d   : > { %v1071_v36 = vmul.f32 %v1069_v34, %v1045_v19  ;;  %v1072_v37 = vmul.f32 %v1070_v35, %v1050_v17  ;;  %v1403_v17 = vld [vmem:[%s1790_s1 + $0xa0] sm:$0xff]  ;;  %v1402_v19 = vld [vmem:[%s1790_s1 + $0x98] sm:$0xff] }
 0xa4e   : > { %1166 = vmatpush.bf16.msra.mxu1 %v1403_v17 }
 0xa4f   : > { %v1073_v38 = vmul.f32 %v1071_v36, %v1069_v34  ;;  %v1074_v41 = vmul.f32 %v1072_v37, %v1070_v35  ;;  %v1435_v36 = vld [vmem:[%s1791_s2 + $0x12] ss:$0 sm:$0xff] }
 0xa51   : > { %v1075_v42 = vsel %vm272_vm1, %v1073_v38, 0.0  ;;  %v1076_v43 = vsel %vm272_vm1, %v1074_v41, 0.0 }
 0xa52   : > { %v1077_v44 = vadd.f32 %v1076_v43, %v1075_v42  ;;  %1167 = vmatpush.bf16.msra.mxu1 %v1402_v19 }
 0xa54   : > { %v1078_v45 = vrot.slane %v1077_v44, 4 }
 0xa56   : > { %v1079_v46 = vadd.f32 %v1078_v45, %v1077_v44 }
 0xa58   : > { %v1080_v47 = vrot.slane %v1079_v46, 2 }
 0xa5a   : > { %v1081_v48 = vadd.f32 %v1080_v47, %v1079_v46  ;;  %v1404_v46 = vld [vmem:[%s1790_s1 + $0xa8] sm:$0xff] }
 0xa5b   : > { %1205 = vmatpush.bf16.msra.mxu2 %v1404_v46 }
 0xa5c   : > { %v1082_v49 = vrot.slane %v1081_v48, 1 }
 0xa5e   : > { %v1083_v50 = vadd.f32 %v1082_v49, %v1081_v48  ;;  %v1436_v48 = vld [vmem:[%s1791_s2 + $0x13] ss:$0 sm:$0xff] }
 0xa60   : > { %v1084_v51 = vmul.f32 %v1083_v50, %v1066_v32 }
 0xa62   : > { %v1085_v52 = vadd.f32 1e-05, %v1084_v51 }
 0xa64   : > { %1492 = vrsqrt.f32 %v1085_v52  ;;  %vm1092_vm13 = vweird.f32 %v1085_v52 }
 0xa6a   : > { %v1493_v24 = vpop.eup %1492 }
 0xa6b   : > { %v1087_v25 = vmul.f32 %v1493_v24, %v1085_v52  ;;  %vm1093_vm12 = vweird.f32 %v1493_v24 }
 0xa6c   : > { %vm1094_vm14 = vmor %vm1092_vm13, %vm1093_vm12 }
 0xa6d   : > { %v1088_v53 = vmul.f32 %v1493_v24, %v1087_v25 }
 0xa6f   : > { %v1089_v54 = vmul.f32 0.5, %v1088_v53  ;;  %v1437_v53 = vld [vmem:[%s1791_s2 + $0x14] ss:$0 sm:$0xff] }
 0xa71   : > { %v1090_v55 = vsub.f32 1.5, %v1089_v54 }
 0xa73   : > { %v1091_v56 = vmul.f32 %v1493_v24, %v1090_v55 }
 0xa75   : > { %v1095_v57 = vsel %vm1094_vm14, %v1493_v24, %v1091_v56 }
 0xa76   : > { %v1096_v58 = vmul.f32 %v1095_v57, %v1069_v34  ;;  %v1097_v59 = vmul.f32 %v1095_v57, %v1070_v35 }
 0xa78   : > { %v1098_v61 = vsel %vm272_vm1, %v1096_v58, 0.0  ;;  %v1099_v62 = vsel %vm272_vm1, %v1097_v59, 0.0 }
 0xa79   : > { %v1100_v63 = vadd.f32 %v1099_v62, %v1098_v61 }
 0xa7b   : > { %v1101_v0 = vrot.slane %v1100_v63, 4 }
 0xa7d   : > { %v1102_v1 = vadd.f32 %v1101_v0, %v1100_v63 }
 0xa7f   : > { %v1103_v2 = vrot.slane %v1102_v1, 2 }
 0xa81   : > { %v1104_v3 = vadd.f32 %v1103_v2, %v1102_v1 }
 0xa83   : > { %v1105_v4 = vrot.slane %v1104_v3, 1 }
 0xa85   : > { %v1106_v5 = vadd.f32 %v1105_v4, %v1104_v3 }
 0xa87   : > { %v1107_v6 = vmul.f32 %v1106_v5, %v1594_v60 }
 0xa89   : > { %v1108_v7 = vsub.f32 %v1096_v58, %v1107_v6  ;;  %v1109_v8 = vsub.f32 %v1097_v59, %v1107_v6 }
 0xa8b   : > { %v1110_v9 = vmul.f32 %v1108_v7, %v1108_v7  ;;  %v1111_v10 = vmul.f32 %v1109_v8, %v1109_v8 }
 0xa8d   : > { %v1112_v12 = vsel %vm272_vm1, %v1110_v9, 0.0  ;;  %v1113_v11 = vsel %vm272_vm1, %v1111_v10, 0.0 }
 0xa8e   : > { %v1114_v13 = vadd.f32 %v1113_v11, %v1112_v12 }
 0xa90   : > { %v1115_v14 = vrot.slane %v1114_v13, 4 }
 0xa92   : > { %v1116_v15 = vadd.f32 %v1115_v14, %v1114_v13 }
 0xa94   : > { %v1117_v16 = vrot.slane %v1116_v15, 2 }
 0xa96   : > { %v1118_v18 = vadd.f32 %v1117_v16, %v1116_v15 }
 0xa98   : > { %v1119_v20 = vrot.slane %v1118_v18, 1 }
 0xa9a   : > { %v1120_v21 = vadd.f32 %v1119_v20, %v1118_v18 }
 0xa9c   : > { %v1121_v22 = vmul.f32 %v1120_v21, %v1594_v60 }
 0xa9e   : > { %v1122_v26 = vadd.f32 1e-05, %v1121_v22 }
 0xaa0   : > { %1494 = vrsqrt.f32 %v1122_v26  ;;  %vm1129_vm0 = vweird.f32 %v1122_v26 }
 0xaa6   : > { %v1495_v27 = vpop.eup %1494 }
 0xaa7   : > { %v1124_v28 = vmul.f32 %v1495_v27, %v1122_v26  ;;  %vm1130_vm15 = vweird.f32 %v1495_v27 }
 0xaa8   : > { %vm1131_vm4 = vmor %vm1129_vm0, %vm1130_vm15 }
 0xaa9   : > { %v1125_v29 = vmul.f32 %v1495_v27, %v1124_v28 }
 0xaab   : > { %v1126_v30 = vmul.f32 0.5, %v1125_v29 }
 0xaad   : > { %v1127_v31 = vsub.f32 1.5, %v1126_v30 }
 0xaaf   : > { %v1128_v32 = vmul.f32 %v1495_v27, %v1127_v31 }
 0xab1   : > { %v1132_v60 = vsel %vm1131_vm4, %v1495_v27, %v1128_v32 }
 0xab2   : > { %v1133_v34 = vmul.f32 %v1132_v60, %v1108_v7  ;;  %v1134_v35 = vmul.f32 %v1132_v60, %v1109_v8 }
 0xab4   : > { %v1136_v37 = vmul.f32 %v1434_v33, %v1133_v34  ;;  %v1137_v38 = vmul.f32 %v1434_v33, %v1134_v35 }
 0xab6   : > { %v1139_v41 = vadd.f32 %v1435_v36, %v1136_v37  ;;  %v1140_v42 = vadd.f32 %v1435_v36, %v1137_v38 }
 0xab8   : > { %v1141_v43 = vmax.f32 %v1139_v41, 0.0  ;;  %v1142_v44 = vmax.f32 %v1140_v42, 0.0 }
 0xaba   : > { %v1143_v45 = vpack.c.bf16 %v1142_v44, %v1141_v43 }
 0xabc   : > { %1371 = vmatmul.msk.bf16.vlgmr.msra.gmra.mxu1 %vm272_vm1, %v1143_v45 }
 0xb39   : > { %v1169_v47 = vpop.f32.mrf.mxu1 }
 0xb3a   : > { %v1170_v49 = vadd.f32 %v1436_v48, %v1169_v47 }
 0xb3c   : > { %v1174_v52 = vadd.f32 %v1170_v49, %v1669_v39 }
 0xb41   : > { %v1171_v50 = vpop.f32.mrf.mxu1 }
 0xb42   : > { %v1172_v51 = vadd.f32 %v1436_v48, %v1171_v50 }
 0xb44   : > { %v1175_v24 = vadd.f32 %v1172_v51, %v1672_v40 }
 0xb46   : > { %v1180_v25 = vpack.c.bf16 %v1175_v24, %v1174_v52 }
 0xb48   : > { %1380 = vmatmul.msk.bf16.vlgmr.msra.gmra.mxu2 %vm272_vm1, %v1180_v25 }
 0xbcb   : > { %v1207_v54 = vpop.f32.mrf.mxu2 }
 0xbcc   : > { %v1208_v55 = vadd.f32 %v1437_v53, %v1207_v54 }
 0xbce   : > { %1212 = vst.msk [vmem:[%s172_s29] sm:$0xff] %vm324_vm3, %v1208_v55 }
 0xbd3   : > { %v1209_v56 = vpop.f32.mrf.mxu2 }
 0xbd4   : > { %v1210_v39 = vadd.f32 %v1437_v53, %v1209_v56 }
 0xbd6   : > { %1213 = vst.msk [vmem:[%s172_s29 + $0x8] sm:$0xff] %vm324_vm3, %v1210_v39 }
 0xbd7 PF: > { %s13_s12 = sadd.s32 1, %s1502_s12  }
 0xbd8   : > { %p10_p4 = scmp.ge.s32.totalorder %s13_s12, 4  }
 0xbda   :  { %12 = sbr.rel (!%p10_p4) target bundleno = 1 (0x1), region = 62 }

</bundles_post_ra>
